<compile_context>
chip_gen: v7x
topology: tpu7x:2x2x1
jax: 0.10.0
libtpu: 0.0.40
codegen_flags: <defaults>
</compile_context>

<pallas_src>
import functools

import jax
import jax.numpy as jnp
import numpy as np
from jax.experimental import pallas as pl
from jax.experimental.pallas import tpu as pltpu


def _pick_tile(n, target, quantum):
    """Largest multiple of `quantum` that divides n, capped at `target`.

    Falls back to n itself (a full-extent block is always legal)."""
    t = min(target, n)
    t -= t % quantum
    while t >= quantum:
        if n % t == 0:
            return t
        t -= quantum
    return n


def _loss_kernel(labc_ref, labr_ref, sim_ref, cf_ref, sem_ref,
                 out_ref,
                 simrow_acc, inter_acc, union_acc,
                 *, alpha, m0, m1):
    ct = pl.program_id(2)
    last_ct = pl.num_programs(2) - 1

    # ---- init per (b, row-tile) accumulators at the first column tile ----
    @pl.when(ct == 0)
    def _init():
        simrow_acc[...] = jnp.zeros_like(simrow_acc)
        inter_acc[...] = jnp.zeros_like(inter_acc)
        union_acc[...] = jnp.zeros_like(union_acc)

    sim = sim_ref[...]                      # (TM, TN) f32
    cls_i = labc_ref[:, 0:1]                # (TM, 1)  int32 (row-tile classes)
    inst_i = labc_ref[:, 1:2]               # (TM, 1)  int32 (row-tile instances)
    cls_j = labr_ref[0:1, :]                # (1, TN)  int32 (col-tile classes)
    inst_j = labr_ref[1:2, :]               # (1, TN)  int32 (col-tile instances)

    same_inst = inst_i == inst_j            # (TM, TN) bool  (== gt_group)
    same_cls = cls_i == cls_j               # (TM, TN) bool  (== gt_sem)

    # ---- similarity (double-hinge) loss, fused with selects ----
    margin_sel = jnp.where(same_cls, m0, m1)
    scale_sel = jnp.where(same_cls, alpha, 1.0)
    hinge = jnp.maximum(margin_sel - sim, 0.0)
    loss_tile = jnp.where(same_inst, sim, scale_sel * hinge)
    simrow_acc[...] += jnp.sum(loss_tile, axis=1, keepdims=True)

    # ---- row-wise intersection / union partial counts (confidence loss) ----
    gtb = same_inst.astype(jnp.float32)
    predb = (sim < m0).astype(jnp.float32)
    inter_elem = gtb * predb
    union_elem = gtb + predb - inter_elem   # == logical_or for 0/1 values
    inter_acc[...] += jnp.sum(inter_elem, axis=1, keepdims=True)
    union_acc[...] += jnp.sum(union_elem, axis=1, keepdims=True)

    # ---- finalize once per (b, row-tile) at the last column tile ----
    @pl.when(ct == last_ct)
    def _finalize():
        sim_total = jnp.sum(simrow_acc[...])                       # scalar

        cf_gt = inter_acc[...] / union_acc[...]                    # (TM, 1); union >= 1 (diagonal)
        d = cf_gt - cf_ref[...]
        cf_sq = jnp.sum(d * d)                                     # scalar (sum of squared diffs)

        sem = sem_ref[...]                                         # (TM, C) log-probs
        col_ids = jax.lax.broadcasted_iota(jnp.int32, sem.shape, 1)
        nll = -jnp.sum(jnp.where(col_ids == cls_i, sem, 0.0))      # scalar

        rid = jax.lax.broadcasted_iota(jnp.int32, out_ref.shape, 0)
        out_ref[...] = jnp.where(
            rid == 0, sim_total,
            jnp.where(rid == 1, cf_sq,
                      jnp.where(rid == 2, nll, 0.0)))


def get_loss_pallas(pred, label, alpha=10.0, margin=(1.0, 2.0)):
    pred_simmat, pred_cfmat, pred_semmat = pred
    pred_simmat = pred_simmat.astype(jnp.float32)
    pred_cfmat = pred_cfmat.astype(jnp.float32)
    pred_semmat = pred_semmat.astype(jnp.float32)

    B, N, _ = pred_simmat.shape
    C = pred_semmat.shape[-1]

    class_gt = label[:, 0, :].astype(jnp.int32)
    inst_gt = label[:, 1, :].astype(jnp.int32)

    # Lane-dense packed label views (one for rows of the tile, one for cols).
    labels_row = jnp.stack([class_gt, inst_gt], axis=1)   # (B, 2, N) int32
    labels_col = jnp.stack([class_gt, inst_gt], axis=2)   # (B, N, 2) int32
    cf_col = pred_cfmat.reshape(B, N, 1)                  # (B, N, 1) f32

    # Tile sizes: modest sublane tile, wide lane tile (fits v7x VMEM with
    # double buffering: 256x2048 f32 = 2 MiB per buffer).
    tm = _pick_tile(N, 256, 8)
    tn = _pick_tile(N, 2048, 128)
    n_row_tiles = N // tm
    n_col_tiles = N // tn

    kernel = functools.partial(_loss_kernel, alpha=float(alpha),
                               m0=float(margin[0]), m1=float(margin[1]))

    grid_spec = pltpu.PrefetchScalarGridSpec(
        num_scalar_prefetch=0,
        grid=(B, n_row_tiles, n_col_tiles),
        in_specs=[
            pl.BlockSpec((None, tm, 2), lambda b, r, c: (b, r, 0)),    # labels_col
            pl.BlockSpec((None, 2, tn), lambda b, r, c: (b, 0, c)),    # labels_row
            pl.BlockSpec((None, tm, tn), lambda b, r, c: (b, r, c)),   # pred_simmat
            pl.BlockSpec((None, tm, 1), lambda b, r, c: (b, r, 0)),    # pred_cfmat
            pl.BlockSpec((None, tm, C), lambda b, r, c: (b, r, 0)),    # pred_semmat
        ],
        out_specs=pl.BlockSpec((None, None, 8, 128),
                               lambda b, r, c: (b, r, 0, 0)),
        scratch_shapes=[
            pltpu.VMEM((tm, 1), jnp.float32),   # simrow_acc
            pltpu.VMEM((tm, 1), jnp.float32),   # inter_acc
            pltpu.VMEM((tm, 1), jnp.float32),   # union_acc
        ],
    )

    partials = pl.pallas_call(
        kernel,
        grid_spec=grid_spec,
        out_shape=jax.ShapeDtypeStruct((B, n_row_tiles, 8, 128), jnp.float32),
        compiler_params=pltpu.CompilerParams(
            dimension_semantics=("parallel", "parallel", "arbitrary"),
            vmem_limit_bytes=48 * 1024 * 1024),
    )(labels_col, labels_row, pred_simmat, cf_col, pred_semmat)

    # Tiny final reductions over the per-(batch, row-tile) partials.
    sim_loss = jnp.sum(partials[:, :, 0, 0]) / (B * N * N)
    cf_loss = jnp.sum(jnp.sqrt(jnp.sum(partials[:, :, 1, 0], axis=1))) / B
    sem_loss = jnp.sum(partials[:, :, 2, 0]) / (B * N)
    return sim_loss, cf_loss, sem_loss


def reference_get_loss(pred, label, alpha=10.0, margin=(1.0, 2.0)):
    """Pure-JAX reference matching the PyTorch forward."""
    pred_simmat, pred_cfmat, pred_semmat = pred
    pred_simmat = pred_simmat.astype(jnp.float32)
    class_gt = label[:, 0, :].astype(jnp.int32)
    inst_gt = label[:, 1, :].astype(jnp.int32)
    B = pred_simmat.shape[0]

    gt_group = (inst_gt[:, :, None] == inst_gt[:, None, :]).astype(jnp.float32)
    gt_sem = (class_gt[:, :, None] == class_gt[:, None, :]).astype(jnp.float32)

    diff_same = (1.0 - gt_group) * gt_sem
    diff_diff = (1.0 - gt_group) * (1.0 - gt_sem)
    simmat_loss = (pred_simmat * gt_group
                   + alpha * diff_same * jnp.maximum(margin[0] - pred_simmat, 0.0)
                   + diff_diff * jnp.maximum(margin[1] - pred_simmat, 0.0))
    sim_loss = simmat_loss.mean()

    gtb = gt_group > 0.5
    predb = pred_simmat < margin[0]
    union = jnp.sum(jnp.logical_or(gtb, predb).astype(jnp.float32), axis=2)
    inter = jnp.sum(jnp.logical_and(gtb, predb).astype(jnp.float32), axis=2)
    cf_gt = inter / union
    cf_loss = jnp.sum(jnp.linalg.norm(cf_gt - pred_cfmat, axis=1)) / B

    picked = jnp.take_along_axis(pred_semmat, class_gt[:, :, None], axis=2)[..., 0]
    sem_loss = jnp.sum(jnp.mean(-picked, axis=1)) / B
    return sim_loss, cf_loss, sem_loss


if __name__ == "__main__":
    key = jax.random.PRNGKey(0)
    B, N, C, NINST = 2, 128, 8, 5
    k1, k2, k3, k4, k5 = jax.random.split(key, 5)

    # Synthetic "predictions" consistent with the module's expectations.
    pred_simmat = jnp.abs(jax.random.normal(k1, (B, N, N), jnp.float32)) * 1.5
    pred_cfmat = jax.nn.sigmoid(jax.random.normal(k2, (B, N), jnp.float32))
    pred_semmat = jax.nn.log_softmax(
        jax.random.normal(k3, (B, N, C), jnp.float32), axis=-1)

    class_gt = jax.random.randint(k4, (B, N), 0, C)
    inst_gt = jax.random.randint(k5, (B, N), 0, NINST)
    label = jnp.stack([class_gt, inst_gt], axis=1).astype(jnp.float32)  # [B,2,N]

    pred = (pred_simmat, pred_cfmat, pred_semmat)

    out = get_loss_pallas(pred, label)
    out = jax.block_until_ready(out)

    ref = reference_get_loss(pred, label)
    for got, want in zip(out, ref):
        np.testing.assert_allclose(np.asarray(got), np.asarray(want),
                                   rtol=1e-4, atol=1e-5)
    print("KERNEL_OK")
</pallas_src>

<mosaic_0001>
module attributes {stable_mosaic.version = 11 : i64} {
  func.func @_loss_kernel(%arg0: i32, %arg1: i32, %arg2: i32, %arg3: memref<1x128x2xi32, #tpu.memory_space<vmem>>, %arg4: memref<1x2x128xi32, #tpu.memory_space<vmem>>, %arg5: memref<1x128x128xf32, #tpu.memory_space<vmem>>, %arg6: memref<1x128x1xf32, #tpu.memory_space<vmem>>, %arg7: memref<1x128x8xf32, #tpu.memory_space<vmem>>, %arg8: memref<1x1x8x128xf32, #tpu.memory_space<vmem>>, %arg9: memref<128x1xf32, #tpu.memory_space<vmem>>, %arg10: memref<128x1xf32, #tpu.memory_space<vmem>>, %arg11: memref<128x1xf32, #tpu.memory_space<vmem>>) attributes {dimension_semantics = [#tpu.dimension_semantics<parallel>, #tpu.dimension_semantics<parallel>, #tpu.dimension_semantics<arbitrary>], iteration_bounds = array<i64: 2, 1, 1>, scalar_prefetch = 0 : i64, scratch_operands = 3 : i64, tpu.core_type = #tpu.core_type<tc>, window_params = [{transform_indices = @transform_0, window_bounds = array<i64: 1, 128, 2>}, {transform_indices = @transform_1, window_bounds = array<i64: 1, 2, 128>}, {transform_indices = @transform_2, window_bounds = array<i64: 1, 128, 128>}, {transform_indices = @transform_3, window_bounds = array<i64: 1, 128, 1>}, {transform_indices = @transform_4, window_bounds = array<i64: 1, 128, 8>}, {transform_indices = @transform_5, window_bounds = array<i64: 1, 1, 8, 128>}]} {
    %c0_i32 = arith.constant 0 : i32
    %0 = arith.cmpi eq, %arg2, %c0_i32 : i32
    %1 = arith.extui %0 : i1 to i32
    %c0_i32_0 = arith.constant 0 : i32
    %2 = arith.cmpi ne, %1, %c0_i32_0 : i32
    scf.if %2 {
      %cst_36 = arith.constant 0.000000e+00 : f32
      %57 = vector.broadcast %cst_36 : f32 to vector<128x1xf32>
      %c0_37 = arith.constant 0 : index
      %c0_38 = arith.constant 0 : index
      %58 = vector.load %arg9[%c0_37, %c0_38] : memref<128x1xf32, #tpu.memory_space<vmem>>, vector<128x1xf32>
      tpu.vector_store %arg9[%c0_37, %c0_38], %57 {strides = array<i32>} : memref<128x1xf32, #tpu.memory_space<vmem>>, vector<128x1xf32>,
      %cst_39 = arith.constant 0.000000e+00 : f32
      %59 = vector.broadcast %cst_39 : f32 to vector<128x1xf32>
      %c0_40 = arith.constant 0 : index
      %c0_41 = arith.constant 0 : index
      %60 = vector.load %arg10[%c0_40, %c0_41] : memref<128x1xf32, #tpu.memory_space<vmem>>, vector<128x1xf32>
      tpu.vector_store %arg10[%c0_40, %c0_41], %59 {strides = array<i32>} : memref<128x1xf32, #tpu.memory_space<vmem>>, vector<128x1xf32>,
      %cst_42 = arith.constant 0.000000e+00 : f32
      %61 = vector.broadcast %cst_42 : f32 to vector<128x1xf32>
      %c0_43 = arith.constant 0 : index
      %c0_44 = arith.constant 0 : index
      %62 = vector.load %arg11[%c0_43, %c0_44] : memref<128x1xf32, #tpu.memory_space<vmem>>, vector<128x1xf32>
      tpu.vector_store %arg11[%c0_43, %c0_44], %61 {strides = array<i32>} : memref<128x1xf32, #tpu.memory_space<vmem>>, vector<128x1xf32>,
    } else {
    }
    %c0 = arith.constant 0 : index
    %c0_1 = arith.constant 0 : index
    %c0_2 = arith.constant 0 : index
    %3 = vector.load %arg5[%c0, %c0_1, %c0_2] : memref<1x128x128xf32, #tpu.memory_space<vmem>>, vector<1x128x128xf32>
    %4 = vector.shape_cast %3 : vector<1x128x128xf32> to vector<128x128xf32>
    %c0_3 = arith.constant 0 : index
    %c0_4 = arith.constant 0 : index
    %c0_5 = arith.constant 0 : index
    %5 = vector.load %arg3[%c0_3, %c0_4, %c0_5] : memref<1x128x2xi32, #tpu.memory_space<vmem>>, vector<1x128x1xi32>
    %6 = vector.shape_cast %5 : vector<1x128x1xi32> to vector<128x1xi32>
    %c0_6 = arith.constant 0 : index
    %c0_7 = arith.constant 0 : index
    %c1 = arith.constant 1 : index
    %7 = vector.load %arg3[%c0_6, %c0_7, %c1] : memref<1x128x2xi32, #tpu.memory_space<vmem>>, vector<1x128x1xi32>
    %8 = vector.shape_cast %7 : vector<1x128x1xi32> to vector<128x1xi32>
    %c0_8 = arith.constant 0 : index
    %c0_9 = arith.constant 0 : index
    %c0_10 = arith.constant 0 : index
    %9 = vector.load %arg4[%c0_8, %c0_9, %c0_10] : memref<1x2x128xi32, #tpu.memory_space<vmem>>, vector<1x1x128xi32>
    %10 = vector.shape_cast %9 : vector<1x1x128xi32> to vector<1x128xi32>
    %c0_11 = arith.constant 0 : index
    %c1_12 = arith.constant 1 : index
    %c0_13 = arith.constant 0 : index
    %11 = vector.load %arg4[%c0_11, %c1_12, %c0_13] : memref<1x2x128xi32, #tpu.memory_space<vmem>>, vector<1x1x128xi32>
    %12 = vector.shape_cast %11 : vector<1x1x128xi32> to vector<1x128xi32>
    %13 = vector.broadcast %8 : vector<128x1xi32> to vector<128x128xi32>
    %14 = vector.broadcast %12 : vector<1x128xi32> to vector<128x128xi32>
    %15 = arith.cmpi eq, %13, %14 : vector<128x128xi32>
    %16 = vector.broadcast %6 : vector<128x1xi32> to vector<128x128xi32>
    %17 = vector.broadcast %10 : vector<1x128xi32> to vector<128x128xi32>
    %18 = arith.cmpi eq, %16, %17 : vector<128x128xi32>
    %cst = arith.constant 1.000000e+00 : f32
    %cst_14 = arith.constant 2.000000e+00 : f32
    %19 = vector.broadcast %cst : f32 to vector<128x128xf32>
    %20 = vector.broadcast %cst_14 : f32 to vector<128x128xf32>
    %21 = arith.select %18, %19, %20 : vector<128x128xi1>, vector<128x128xf32>
    %cst_15 = arith.constant 1.000000e+01 : f32
    %cst_16 = arith.constant 1.000000e+00 : f32
    %22 = vector.broadcast %cst_15 : f32 to vector<128x128xf32>
    %23 = vector.broadcast %cst_16 : f32 to vector<128x128xf32>
    %24 = arith.select %18, %22, %23 : vector<128x128xi1>, vector<128x128xf32>
    %25 = arith.subf %21, %4 : vector<128x128xf32>
    %cst_17 = arith.constant 0.000000e+00 : f32
    %26 = vector.broadcast %cst_17 : f32 to vector<128x128xf32>
    %27 = arith.maximumf %25, %26 : vector<128x128xf32>
    %28 = arith.mulf %24, %27 : vector<128x128xf32>
    %29 = arith.select %15, %4, %28 : vector<128x128xi1>, vector<128x128xf32>
    %c0_18 = arith.constant 0 : index
    %c0_19 = arith.constant 0 : index
    %30 = vector.load %arg9[%c0_18, %c0_19] : memref<128x1xf32, #tpu.memory_space<vmem>>, vector<128x1xf32>
    %cst_20 = arith.constant dense<0.000000e+00> : vector<128xf32>
    %31 = vector.multi_reduction <add>, %29, %cst_20 [1] : vector<128x128xf32> to vector<128xf32>
    %32 = vector.shape_cast %31 : vector<128xf32> to vector<128x1xf32>
    %33 = arith.addf %30, %32 : vector<128x1xf32>
    %c0_21 = arith.constant 0 : index
    %c0_22 = arith.constant 0 : index
    %34 = vector.load %arg9[%c0_21, %c0_22] : memref<128x1xf32, #tpu.memory_space<vmem>>, vector<128x1xf32>
    tpu.vector_store %arg9[%c0_21, %c0_22], %33 {strides = array<i32>} : memref<128x1xf32, #tpu.memory_space<vmem>>, vector<128x1xf32>,
    %35 = arith.extui %15 : vector<128x128xi1> to vector<128x128xi32>
    %36 = arith.sitofp %35 : vector<128x128xi32> to vector<128x128xf32>
    %cst_23 = arith.constant 1.000000e+00 : f32
    %37 = vector.broadcast %cst_23 : f32 to vector<128x128xf32>
    %38 = arith.cmpf olt, %4, %37 : vector<128x128xf32>
    %39 = arith.extui %38 : vector<128x128xi1> to vector<128x128xi32>
    %40 = arith.sitofp %39 : vector<128x128xi32> to vector<128x128xf32>
    %41 = arith.mulf %36, %40 : vector<128x128xf32>
    %42 = arith.addf %36, %40 : vector<128x128xf32>
    %43 = arith.subf %42, %41 : vector<128x128xf32>
    %c0_24 = arith.constant 0 : index
    %c0_25 = arith.constant 0 : index
    %44 = vector.load %arg10[%c0_24, %c0_25] : memref<128x1xf32, #tpu.memory_space<vmem>>, vector<128x1xf32>
    %cst_26 = arith.constant dense<0.000000e+00> : vector<128xf32>
    %45 = vector.multi_reduction <add>, %41, %cst_26 [1] : vector<128x128xf32> to vector<128xf32>
    %46 = vector.shape_cast %45 : vector<128xf32> to vector<128x1xf32>
    %47 = arith.addf %44, %46 : vector<128x1xf32>
    %c0_27 = arith.constant 0 : index
    %c0_28 = arith.constant 0 : index
    %48 = vector.load %arg10[%c0_27, %c0_28] : memref<128x1xf32, #tpu.memory_space<vmem>>, vector<128x1xf32>
    tpu.vector_store %arg10[%c0_27, %c0_28], %47 {strides = array<i32>} : memref<128x1xf32, #tpu.memory_space<vmem>>, vector<128x1xf32>,
    %c0_29 = arith.constant 0 : index
    %c0_30 = arith.constant 0 : index
    %49 = vector.load %arg11[%c0_29, %c0_30] : memref<128x1xf32, #tpu.memory_space<vmem>>, vector<128x1xf32>
    %cst_31 = arith.constant dense<0.000000e+00> : vector<128xf32>
    %50 = vector.multi_reduction <add>, %43, %cst_31 [1] : vector<128x128xf32> to vector<128xf32>
    %51 = vector.shape_cast %50 : vector<128xf32> to vector<128x1xf32>
    %52 = arith.addf %49, %51 : vector<128x1xf32>
    %c0_32 = arith.constant 0 : index
    %c0_33 = arith.constant 0 : index
    %53 = vector.load %arg11[%c0_32, %c0_33] : memref<128x1xf32, #tpu.memory_space<vmem>>, vector<128x1xf32>
    tpu.vector_store %arg11[%c0_32, %c0_33], %52 {strides = array<i32>} : memref<128x1xf32, #tpu.memory_space<vmem>>, vector<128x1xf32>,
    %c0_i32_34 = arith.constant 0 : i32
    %54 = arith.cmpi eq, %arg2, %c0_i32_34 : i32
    %55 = arith.extui %54 : i1 to i32
    %c0_i32_35 = arith.constant 0 : i32
    %56 = arith.cmpi ne, %55, %c0_i32_35 : i32
    scf.if %56 {
      %c0_36 = arith.constant 0 : index
      %c0_37 = arith.constant 0 : index
      %57 = vector.load %arg9[%c0_36, %c0_37] : memref<128x1xf32, #tpu.memory_space<vmem>>, vector<128x1xf32>
      %58 = vector.shape_cast %57 : vector<128x1xf32> to vector<1x128x1xf32>
      %cst_38 = arith.constant dense<0.000000e+00> : vector<1xf32>
      %59 = vector.multi_reduction <add>, %58, %cst_38 [1, 2] : vector<1x128x1xf32> to vector<1xf32>
      %60 = vector.shape_cast %59 : vector<1xf32> to vector<1x1x1xf32>
      %61 = vector.extract %60[0, 0, 0] : f32 from vector<1x1x1xf32>
      %c0_39 = arith.constant 0 : index
      %c0_40 = arith.constant 0 : index
      %62 = vector.load %arg10[%c0_39, %c0_40] : memref<128x1xf32, #tpu.memory_space<vmem>>, vector<128x1xf32>
      %c0_41 = arith.constant 0 : index
      %c0_42 = arith.constant 0 : index
      %63 = vector.load %arg11[%c0_41, %c0_42] : memref<128x1xf32, #tpu.memory_space<vmem>>, vector<128x1xf32>
      %64 = arith.divf %62, %63 : vector<128x1xf32>
      %c0_43 = arith.constant 0 : index
      %c0_44 = arith.constant 0 : index
      %c0_45 = arith.constant 0 : index
      %65 = vector.load %arg6[%c0_43, %c0_44, %c0_45] : memref<1x128x1xf32, #tpu.memory_space<vmem>>, vector<1x128x1xf32>
      %66 = vector.shape_cast %65 : vector<1x128x1xf32> to vector<128x1xf32>
      %67 = arith.subf %64, %66 : vector<128x1xf32>
      %68 = arith.mulf %67, %67 : vector<128x1xf32>
      %69 = vector.shape_cast %68 : vector<128x1xf32> to vector<1x128x1xf32>
      %cst_46 = arith.constant dense<0.000000e+00> : vector<1xf32>
      %70 = vector.multi_reduction <add>, %69, %cst_46 [1, 2] : vector<1x128x1xf32> to vector<1xf32>
      %71 = vector.shape_cast %70 : vector<1xf32> to vector<1x1x1xf32>
      %72 = vector.extract %71[0, 0, 0] : f32 from vector<1x1x1xf32>
      %c0_47 = arith.constant 0 : index
      %c0_48 = arith.constant 0 : index
      %c0_49 = arith.constant 0 : index
      %73 = vector.load %arg7[%c0_47, %c0_48, %c0_49] : memref<1x128x8xf32, #tpu.memory_space<vmem>>, vector<1x128x8xf32>
      %74 = vector.shape_cast %73 : vector<1x128x8xf32> to vector<128x8xf32>
      %75 = tpu.iota {dimensions = array<i32: 1>} : vector<128x8xi32>
      %76 = vector.broadcast %6 : vector<128x1xi32> to vector<128x8xi32>
      %77 = arith.cmpi eq, %75, %76 : vector<128x8xi32>
      %cst_50 = arith.constant 0.000000e+00 : f32
      %78 = vector.broadcast %cst_50 : f32 to vector<128x8xf32>
      %79 = arith.select %77, %74, %78 : vector<128x8xi1>, vector<128x8xf32>
      %80 = vector.shape_cast %79 : vector<128x8xf32> to vector<1x128x8xf32>
      %cst_51 = arith.constant dense<0.000000e+00> : vector<1xf32>
      %81 = vector.multi_reduction <add>, %80, %cst_51 [1, 2] : vector<1x128x8xf32> to vector<1xf32>
      %82 = vector.shape_cast %81 : vector<1xf32> to vector<1x1x1xf32>
      %83 = vector.extract %82[0, 0, 0] : f32 from vector<1x1x1xf32>
      %cst_52 = arith.constant 0.000000e+00 : f32
      %84 = arith.subf %cst_52, %83 : f32
      %85 = tpu.iota {dimensions = array<i32: 0>} : vector<8x128xi32>
      %c0_i32_53 = arith.constant 0 : i32
      %86 = vector.broadcast %c0_i32_53 : i32 to vector<8x128xi32>
      %87 = arith.cmpi eq, %85, %86 : vector<8x128xi32>
      %c1_i32 = arith.constant 1 : i32
      %88 = vector.broadcast %c1_i32 : i32 to vector<8x128xi32>
      %89 = arith.cmpi eq, %85, %88 : vector<8x128xi32>
      %c2_i32 = arith.constant 2 : i32
      %90 = vector.broadcast %c2_i32 : i32 to vector<8x128xi32>
      %91 = arith.cmpi eq, %85, %90 : vector<8x128xi32>
      %cst_54 = arith.constant 0.000000e+00 : f32
      %92 = vector.broadcast %84 : f32 to vector<8x128xf32>
      %93 = vector.broadcast %cst_54 : f32 to vector<8x128xf32>
      %94 = arith.select %91, %92, %93 : vector<8x128xi1>, vector<8x128xf32>
      %95 = vector.broadcast %72 : f32 to vector<8x128xf32>
      %96 = arith.select %89, %95, %94 : vector<8x128xi1>, vector<8x128xf32>
      %97 = vector.broadcast %61 : f32 to vector<8x128xf32>
      %98 = arith.select %87, %97, %96 : vector<8x128xi1>, vector<8x128xf32>
      %c0_55 = arith.constant 0 : index
      %c0_56 = arith.constant 0 : index
      %c0_57 = arith.constant 0 : index
      %c0_58 = arith.constant 0 : index
      %99 = vector.load %arg8[%c0_55, %c0_56, %c0_57, %c0_58] : memref<1x1x8x128xf32, #tpu.memory_space<vmem>>, vector<1x1x8x128xf32>
      %100 = vector.shape_cast %99 : vector<1x1x8x128xf32> to vector<8x128xf32>
      %101 = vector.shape_cast %98 : vector<8x128xf32> to vector<1x1x8x128xf32>
      tpu.vector_store %arg8[%c0_55, %c0_56, %c0_57, %c0_58], %101 {strides = array<i32>} : memref<1x1x8x128xf32, #tpu.memory_space<vmem>>, vector<1x1x8x128xf32>,
    } else {
    }
    return
  }
  func.func @transform_0(%arg0: i32, %arg1: i32, %arg2: i32) -> (i32, i32, i32) {
    %c0_i32 = arith.constant 0 : i32
    %c0_i32_0 = arith.constant 0 : i32
    return %arg0, %arg1, %c0_i32 : i32, i32, i32
  }
  func.func @transform_1(%arg0: i32, %arg1: i32, %arg2: i32) -> (i32, i32, i32) {
    %c0_i32 = arith.constant 0 : i32
    %c0_i32_0 = arith.constant 0 : i32
    return %arg0, %c0_i32, %arg2 : i32, i32, i32
  }
  func.func @transform_2(%arg0: i32, %arg1: i32, %arg2: i32) -> (i32, i32, i32) {
    %c0_i32 = arith.constant 0 : i32
    return %arg0, %arg1, %arg2 : i32, i32, i32
  }
  func.func @transform_3(%arg0: i32, %arg1: i32, %arg2: i32) -> (i32, i32, i32) {
    %c0_i32 = arith.constant 0 : i32
    %c0_i32_0 = arith.constant 0 : i32
    return %arg0, %arg1, %c0_i32 : i32, i32, i32
  }
  func.func @transform_4(%arg0: i32, %arg1: i32, %arg2: i32) -> (i32, i32, i32) {
    %c0_i32 = arith.constant 0 : i32
    %c0_i32_0 = arith.constant 0 : i32
    return %arg0, %arg1, %c0_i32 : i32, i32, i32
  }
  func.func @transform_5(%arg0: i32, %arg1: i32, %arg2: i32) -> (i32, i32, i32, i32) {
    %c0_i32 = arith.constant 0 : i32
    %c0_i32_0 = arith.constant 0 : i32
    %c0_i32_1 = arith.constant 0 : i32
    return %arg0, %arg1, %c0_i32, %c0_i32_0 : i32, i32, i32, i32
  }
}

</mosaic_0001>

<bundles_post_ra>
// kernel: tpu_custom_call.1
= control target key start
LH: loop header
LB: loop body
LE: loop exit
PB: predicated region body
PF: predicated region fallthrough
CT: control target
= control target key end

     0   :  { %10 = vsyncpa [#allocation6], 0  ;;  %s2814_s0 = inlined_call_operand.vmem [shape: s32[2,128,2], index: 0, kind: input, shape index: {}]   ;;  %s2815_s1 = inlined_call_operand.vmem [shape: s32[2,2,128], index: 1, kind: input, shape index: {}]   ;;  %s2816_s2 = inlined_call_operand.vmem [shape: f32[2,128,128], index: 2, kind: input, shape index: {}]   ;;  %s2817_s3 = inlined_call_operand.vmem [shape: f32[2,128,1], index: 3, kind: input, shape index: {}]   ;;  %s2818_s4 = inlined_call_operand.vmem [shape: f32[2,128,8], index: 4, kind: input, shape index: {}]   ;;  %s2819_s5 = inlined_call_operand.hbm [shape: f32[2,1,8,128], index: 5, kind: output, shape index: {}]  }
   0x1   :  { %12 = vsyncpa [#allocation6 + $0x1], 0  ;;  %s1855_s18 = smov 0   ;;  %s1857_s19 = smov 0  }
   0x2   :  { %s1859_s20 = smov 0   ;;  %s1861_s21 = smov 0  }
   0x3   :  { %s1863_s22 = smov 0   ;;  %s1865_s23 = smov 0  }
   0x4 LB: > { %s1574_s24 = sadd.s32 4294967295, %s1817_s23   ;;  %s1575_s25 = sadd.s32 4294967294, %s1817_s23   ;;  %s1817_s23 = sphi %s1865_s23, %s18_s23   ;;  %s1813_s22 = sphi %s1863_s22, %s2913_s22   ;;  %s1809_s21 = sphi %s1861_s21, %s2912_s21   ;;  %s1805_s20 = sphi %s1859_s20, %s2911_s20   ;;  %s1801_s19 = sphi %s1857_s19, %s2910_s19   ;;  %s1797_s18 = sphi %s1855_s18, %s2909_s18  }
   0x5   : > { %s37_s26 = sadd.s32 1, %s1813_s22  ;;  %s188_s27 = sadd.s32 1, %s1805_s20 }
   0x6   : > { %p39_p0 = scmp.ge.s32.totalorder %s37_s26, 2  ;;  %p198_p1 = scmp.ne.s32.totalorder %s1805_s20, %s1801_s19 }
   0x7   : > { %p199_p2 = scmp.eq.s32.totalorder %s1574_s24, 1  ;;  %p204_p3 = scmp.ne.s32.totalorder %s1801_s19, %s1797_s18 }
   0x8   : > { %s2915_s26 = smov (%p39_p0, %s37_s26), 0  ;;  %p205_p5 = scmp.eq.s32.totalorder %s1575_s25, 1 }
   0x9   : > { %p1895_p4 = por %p199_p2, %p198_p1  ;;  %s183_s29 = ssub.s32 %s1813_s22, %s2915_s26 }
   0xa   : > { %p1578_p6 = scmp.ge.s32.totalorder %s1817_s23, 1  ;;  %p186_p7 = scmp.eq.s32.totalorder %s183_s29, 0 }
   0xb   : > { %p1902_p8 = por %p205_p5, %p204_p3  ;;  %p288_p9 = scmp.lt.s32.totalorder %s1817_s23, 3 }
   0xc   : > { %s1908_s6 = scalar_select %p186_p7, %s1805_s20, %s188_s27  }
   0xd   : > { %p289_p10 = pnand %p1578_p6, %p288_p9 }
   0xe   : > { %p358_p11 = scmp.lt.s32.totalorder (!%p289_p10), %s1809_s21, 1  ;;  %v1819_v0 = vmov (!%p289_p10), 1   ;;  %v1820_v10 = vmov (!%p289_p10), 0   ;;  %vm2820_vm0 = vcmask (!%p289_p10), 7168   ;;  %v1821_v18 = vmov (!%p289_p10), 0.0   ;;  %s1624_s16 = sshll.u32 (!%p289_p10), %s1809_s21, 7 }
   0xf   : > { %292 = sbr.rel (%p289_p10) target bundleno = 643 (0x283), region = 40  ;;  %1698 = vset.pattern.permute.xlu1 (!%p289_p10), %v1819_v0  ;;  %1697 = vset.pattern.permute.xlu0 (!%p289_p10), %v1819_v0  ;;  %428 = vst.msk [vmem:[#allocation3] sm:$0xff] (!%p289_p10), %vm2820_vm0, %v1821_v18  ;;  %412 = vst.msk [vmem:[#allocation2] sm:$0xff] (!%p289_p10), %vm2820_vm0, %v1821_v18  ;;  %v2825_v58 = vlaneseq (!%p289_p10)  ;;  %s1824_s9 = smov (!%p289_p10), [#allocation5]  }
  0x10   : > { %413 = vst.msk [vmem:[#allocation2 + $0x8] sm:$0xff] (!%p289_p10), %vm2820_vm0, %v1821_v18  ;;  %414 = vst.msk [vmem:[#allocation2 + $0x10] sm:$0xff] (!%p289_p10), %vm2820_vm0, %v1821_v18 }
  0x11   : > { %415 = vst.msk [vmem:[#allocation2 + $0x18] sm:$0xff] (!%p289_p10), %vm2820_vm0, %v1821_v18  ;;  %416 = vst.msk [vmem:[#allocation2 + $0x20] sm:$0xff] (!%p289_p10), %vm2820_vm0, %v1821_v18 }
  0x12   : > { %417 = vst.msk [vmem:[#allocation2 + $0x28] sm:$0xff] (!%p289_p10), %vm2820_vm0, %v1821_v18  ;;  %418 = vst.msk [vmem:[#allocation2 + $0x30] sm:$0xff] (!%p289_p10), %vm2820_vm0, %v1821_v18 }
  0x13   : > { %419 = vst.msk [vmem:[#allocation2 + $0x38] sm:$0xff] (!%p289_p10), %vm2820_vm0, %v1821_v18  ;;  %420 = vst.msk [vmem:[#allocation2 + $0x40] sm:$0xff] (!%p289_p10), %vm2820_vm0, %v1821_v18 }
  0x14   : > { %421 = vst.msk [vmem:[#allocation2 + $0x48] sm:$0xff] (!%p289_p10), %vm2820_vm0, %v1821_v18  ;;  %422 = vst.msk [vmem:[#allocation2 + $0x50] sm:$0xff] (!%p289_p10), %vm2820_vm0, %v1821_v18 }
  0x15   : > { %423 = vst.msk [vmem:[#allocation2 + $0x58] sm:$0xff] (!%p289_p10), %vm2820_vm0, %v1821_v18  ;;  %424 = vst.msk [vmem:[#allocation2 + $0x60] sm:$0xff] (!%p289_p10), %vm2820_vm0, %v1821_v18 }
  0x16   : > { %s1912_s7 = scalar_select %p358_p11, %s1809_s21, 1  ;;  %425 = vst.msk [vmem:[#allocation2 + $0x68] sm:$0xff] %vm2820_vm0, %v1821_v18  ;;  %426 = vst.msk [vmem:[#allocation2 + $0x70] sm:$0xff] %vm2820_vm0, %v1821_v18 }
  0x17   : > { %427 = vst.msk [vmem:[#allocation2 + $0x78] sm:$0xff] %vm2820_vm0, %v1821_v18  ;;  %429 = vst.msk [vmem:[#allocation3 + $0x8] sm:$0xff] %vm2820_vm0, %v1821_v18 }
  0x18   : > { %s1915_s8 = sshll.u32 %s1912_s7, 7  ;;  %430 = vst.msk [vmem:[#allocation3 + $0x10] sm:$0xff] %vm2820_vm0, %v1821_v18  ;;  %431 = vst.msk [vmem:[#allocation3 + $0x18] sm:$0xff] %vm2820_vm0, %v1821_v18  ;;  %s1582_s15 = sshll.u32 %s1912_s7, 1 }
  0x19   : > { %s1921_s11 = scalar_lea.vmem %s2814_s0, %s1915_s8  ;;  %432 = vst.msk [vmem:[#allocation3 + $0x20] sm:$0xff] %vm2820_vm0, %v1821_v18  ;;  %433 = vst.msk [vmem:[#allocation3 + $0x28] sm:$0xff] %vm2820_vm0, %v1821_v18  ;;  %s2039_s14 = scalar_lea.vmem %s2816_s2, %s1915_s8 }
  0x1a   : > { %v478_v1 = vld [vmem:[%s1921_s11 + $0x10] sm:$0xff]  ;;  %v476_v2 = vld [vmem:[%s1921_s11] sm:$0xff]  ;;  %v479_v3 = vld [vmem:[%s1921_s11 + $0x18] sm:$0xff]  ;;  %434 = vst.msk [vmem:[#allocation3 + $0x30] sm:$0xff] %vm2820_vm0, %v1821_v18  ;;  %s2048_s24 = scalar_lea.vmem %s2815_s1, %s1582_s15  ;;  %s2201_s29 = scalar_lea.vmem %s2818_s4, %s1915_s8 }
  0x1b   : > { %501 = vperm.xlu1 %1698, %v478_v1   ;;  %495 = vperm.xlu0 %1697, %v476_v2   ;;  %v477_v4 = vld [vmem:[%s1921_s11 + $0x8] sm:$0xff]  ;;  %v480_v6 = vld [vmem:[%s1921_s11 + $0x20] sm:$0xff]  ;;  %v483_v7 = vld [vmem:[%s1921_s11 + $0x38] sm:$0xff]  ;;  %435 = vst.msk [vmem:[#allocation3 + $0x38] sm:$0xff] %vm2820_vm0, %v1821_v18  ;;  %s2681_s10 = scalar_lea.vmem %s2817_s3, %s1915_s8  ;;  %s354_s8 = sand.u32 1, %s1801_s19  }
  0x1c   : > { %v481_v5 = vld [vmem:[%s1921_s11 + $0x28] sm:$0xff]  ;;  %v482_v8 = vld [vmem:[%s1921_s11 + $0x30] sm:$0xff]  ;;  %v484_v9 = vld [vmem:[%s1921_s11 + $0x40] sm:$0xff]  ;;  %436 = vst.msk [vmem:[#allocation3 + $0x40] sm:$0xff] %vm2820_vm0, %v1821_v18  ;;  %s1411_s21 = scalar_lea.sflag [#allocation6], %s354_s8 }
  0x1d   : > { %v486_v11 = vld [vmem:[%s1921_s11 + $0x50] sm:$0xff]  ;;  %v485_v12 = vld [vmem:[%s1921_s11 + $0x48] sm:$0xff]  ;;  %v487_v14 = vld [vmem:[%s1921_s11 + $0x58] sm:$0xff]  ;;  %437 = vst.msk [vmem:[#allocation3 + $0x48] sm:$0xff] %vm2820_vm0, %v1821_v18 }
  0x1e   : > { %v489_v13 = vld [vmem:[%s1921_s11 + $0x68] sm:$0xff]  ;;  %v488_v15 = vld [vmem:[%s1921_s11 + $0x60] sm:$0xff]  ;;  %v491_v16 = vld [vmem:[%s1921_s11 + $0x78] sm:$0xff]  ;;  %438 = vst.msk [vmem:[#allocation3 + $0x50] sm:$0xff] %vm2820_vm0, %v1821_v18 }
  0x1f   : > { %504 = vperm.xlu1 %1698, %v479_v3   ;;  %498 = vperm.xlu0 %1697, %v477_v4   ;;  %v490_v17 = vld [vmem:[%s1921_s11 + $0x70] sm:$0xff]  ;;  %439 = vst.msk [vmem:[#allocation3 + $0x58] sm:$0xff] %vm2820_vm0, %v1821_v18  ;;  %440 = vst.msk [vmem:[#allocation3 + $0x60] sm:$0xff] %vm2820_vm0, %v1821_v18  ;;  %v2043_v19 = vld [vmem:[%s2039_s14] sm:$0xff]  ;;  %s1579_s11 = sshll.u32 %s354_s8, 3 }
  0x20   : > { %441 = vst.msk [vmem:[#allocation3 + $0x68] sm:$0xff] %vm2820_vm0, %v1821_v18  ;;  %442 = vst.msk [vmem:[#allocation3 + $0x70] sm:$0xff] %vm2820_vm0, %v1821_v18  ;;  %vm839_vm1 = vcmp.lt.f32.partialorder %v2043_v19, 1.0  ;;  %v2052_v20 = vld [vmem:[%s2039_s14 + $0x8] sm:$0xff]  ;;  %v2055_v21 = vld [vmem:[%s2048_s24 + $0x1] ss:$0 sm:$0xff] }
  0x21   : > { %443 = vst.msk [vmem:[#allocation3 + $0x78] sm:$0xff] %vm2820_vm0, %v1821_v18  ;;  %444 = vst.msk [vmem:[#allocation4] sm:$0xff] %vm2820_vm0, %v1821_v18  ;;  %v1607_v23 = vsel %vm839_vm1, 1.0, %v1821_v18  ;;  %vm840_vm3 = vcmp.lt.f32.partialorder %v2052_v20, 1.0  ;;  %v2066_v25 = vld [vmem:[%s2039_s14 + $0x10] sm:$0xff]  ;;  %v2073_v27 = vld [vmem:[%s2039_s14 + $0x28] sm:$0xff] }
  0x22   : > { %445 = vst.msk [vmem:[#allocation4 + $0x8] sm:$0xff] %vm2820_vm0, %v1821_v18  ;;  %446 = vst.msk [vmem:[#allocation4 + $0x10] sm:$0xff] %vm2820_vm0, %v1821_v18  ;;  %v1608_v30 = vsel %vm840_vm3, 1.0, %v1821_v18  ;;  %vm841_vm4 = vcmp.lt.f32.partialorder %v2066_v25, 1.0  ;;  %vm844_vm7 = vcmp.lt.f32.partialorder %v2073_v27, 1.0  ;;  %v2087_v32 = vld [vmem:[%s2039_s14 + $0x18] sm:$0xff] }
  0x23   : > { %510 = vperm.xlu1 %1698, %v481_v5   ;;  %507 = vperm.xlu0 %1697, %v480_v6   ;;  %447 = vst.msk [vmem:[#allocation4 + $0x18] sm:$0xff] %vm2820_vm0, %v1821_v18  ;;  %448 = vst.msk [vmem:[#allocation4 + $0x20] sm:$0xff] %vm2820_vm0, %v1821_v18  ;;  %v1609_v35 = vsel %vm841_vm4, 1.0, %v1821_v18  ;;  %v1612_v37 = vsel %vm844_vm7, 1.0, %v1821_v18  ;;  %vm842_vm8 = vcmp.lt.f32.partialorder %v2087_v32, 1.0  ;;  %v2116_v41 = vld [vmem:[%s2039_s14 + $0x20] sm:$0xff] }
  0x24   : > { %449 = vst.msk [vmem:[#allocation4 + $0x28] sm:$0xff] %vm2820_vm0, %v1821_v18  ;;  %450 = vst.msk [vmem:[#allocation4 + $0x30] sm:$0xff] %vm2820_vm0, %v1821_v18  ;;  %v1610_v45 = vsel %vm842_vm8, 1.0, %v1821_v18  ;;  %vm843_vm11 = vcmp.lt.f32.partialorder %v2116_v41, 1.0  ;;  %v2134_v49 = vld [vmem:[%s2039_s14 + $0x38] sm:$0xff]  ;;  %v2137_v51 = vld [vmem:[%s2039_s14 + $0x30] sm:$0xff] }
  0x25   : > { %451 = vst.msk [vmem:[#allocation4 + $0x38] sm:$0xff] %vm2820_vm0, %v1821_v18  ;;  %452 = vst.msk [vmem:[#allocation4 + $0x40] sm:$0xff] %vm2820_vm0, %v1821_v18  ;;  %v2140_v52 = vld [vmem:[%s2039_s14 + $0x40] sm:$0xff]  ;;  %v1611_v55 = vsel %vm843_vm11, 1.0, %v1821_v18  ;;  %vm846_vm13 = vcmp.lt.f32.partialorder %v2134_v49, 1.0  ;;  %vm845_vm15 = vcmp.lt.f32.partialorder %v2137_v51, 1.0 }
  0x26   : > { %453 = vst.msk [vmem:[#allocation4 + $0x48] sm:$0xff] %vm2820_vm0, %v1821_v18  ;;  %454 = vst.msk [vmem:[#allocation4 + $0x50] sm:$0xff] %vm2820_vm0, %v1821_v18  ;;  %vm847_vm3 = vcmp.lt.f32.partialorder %v2140_v52, 1.0  ;;  %s356_s17 = scalar_lea.vmem [#allocation5], %s1579_s11 }
  0x27   : > { %516 = vperm.xlu1 %1698, %v483_v7   ;;  %513 = vperm.xlu0 %1697, %v482_v8   ;;  %455 = vst.msk [vmem:[#allocation4 + $0x58] sm:$0xff] %vm2820_vm0, %v1821_v18  ;;  %456 = vst.msk [vmem:[#allocation4 + $0x60] sm:$0xff] %vm2820_vm0, %v1821_v18 }
  0x28   : > { %457 = vst.msk [vmem:[#allocation4 + $0x68] sm:$0xff] %vm2820_vm0, %v1821_v18  ;;  %458 = vst.msk [vmem:[#allocation4 + $0x70] sm:$0xff] %vm2820_vm0, %v1821_v18 }
  0x29   : > { %459 = vst.msk [vmem:[#allocation4 + $0x78] sm:$0xff] %vm2820_vm0, %v1821_v18 }
  0x2b   : > { %1699 = vset.pattern.permute.xlu1 %v1820_v10  ;;  %519 = vperm.xlu0 %1697, %v484_v9  }
  0x2c   : > { %563 = vperm.xlu1 %1699, %v476_v2  }
  0x2f   : > { %525 = vperm.xlu0 %1697, %v486_v11  }
  0x30   : > { %1700 = vset.pattern.permute.xlu1 %v1819_v0 }
  0x31   : > { %522 = vperm.xlu1 %1700, %v485_v12  }
  0x33   : > { %534 = vperm.xlu0 %1697, %v489_v13  }
  0x35   : > { %1701 = vset.pattern.permute.xlu1 %v1820_v10 }
  0x36   : > { %569 = vperm.xlu1 %1701, %v478_v1   ;;  %v1614_v1 = vsel %vm846_vm13, 1.0, %v1821_v18 }
  0x37   : > { %1704 = vset.pattern.permute.xlu0 %v1820_v10 }
  0x38   : > { %566 = vperm.xlu0 %1704, %v477_v4   ;;  %v1613_v4 = vsel %vm845_vm15, 1.0, %v1821_v18  ;;  %vm1356_vm15 = vcmask 64512  }
  0x3a   : > { %572 = vperm.xlu1 %1701, %v479_v3  }
  0x3c   : > { %575 = vperm.xlu0 %1704, %v480_v6   ;;  %v1615_v6 = vsel %vm847_vm3, 1.0, %v1821_v18 }
  0x3e   : > { %1702 = vset.pattern.permute.xlu1 %v1819_v0 }
  0x3f   : > { %528 = vperm.xlu1 %1702, %v487_v14  }
  0x40   : > { %584 = vperm.xlu0 %1704, %v483_v7   ;;  %v2179_v7 = vand.u32 127, %v2825_v58 }
  0x43   : > { %531 = vperm.xlu1 %1702, %v488_v15  }
  0x44   : > { %590 = vperm.xlu0 %1704, %v485_v12   ;;  %v2193_v12 = vld [vmem:[%s2039_s14 + $0x58] sm:$0xff] }
  0x45   : > { %vm850_vm13 = vcmp.lt.f32.partialorder %v2193_v12, 1.0 }
  0x47   : > { %1703 = vset.pattern.permute.xlu1 %v1820_v10 }
  0x48   : > { %578 = vperm.xlu1 %1703, %v481_v5   ;;  %596 = vperm.xlu0 %1704, %v487_v14  }
  0x4c   : > { %581 = vperm.xlu1 %1703, %v482_v8   ;;  %602 = vperm.xlu0 %1704, %v489_v13   ;;  %v2182_v8 = vld [vmem:[%s2039_s14 + $0x50] sm:$0xff] }
  0x4d   : > { %vm849_vm8 = vcmp.lt.f32.partialorder %v2182_v8, 1.0 }
  0x50   : > { %1705 = vset.pattern.permute.xlu1 %v1819_v0  ;;  %608 = vperm.xlu0 %1704, %v491_v16   ;;  %v2163_v0 = vld [vmem:[%s2039_s14 + $0x48] sm:$0xff] }
  0x51   : > { %537 = vperm.xlu1 %1705, %v490_v17   ;;  %vm848_vm7 = vcmp.lt.f32.partialorder %v2163_v0, 1.0 }
  0x55   : > { %540 = vperm.xlu1 %1705, %v491_v16  }
  0x59   : > { %1706 = vset.pattern.permute.xlu1 %v1820_v10 }
  0x5a   : > { %587 = vperm.xlu1 %1706, %v484_v9  }
  0x5e   : > { %593 = vperm.xlu1 %1706, %v486_v11  }
  0x62   : > { %599 = vperm.xlu1 %1706, %v488_v15  }
  0x66   : > { %605 = vperm.xlu1 %1706, %v490_v17  }
  0x9a   : > { %v2057_v22 = vpop.permute.xlu1 %501  ;;  %v2060_v24 = vpop.permute.xlu0 %495 }
  0x9b   : > { %vm546_vm2 = vcmp.eq.s32.totalorder %v2060_v24, %v2055_v21  ;;  %vm548_vm5 = vcmp.eq.s32.totalorder %v2057_v22, %v2055_v21 }
  0x9c   : > { %v1591_v26 = vsel %vm546_vm2, 1.0, %v1821_v18  ;;  %v1593_v36 = vsel %vm548_vm5, 1.0, %v1821_v18 }
  0x9d   : > { %v887_v28 = vmul.f32 %v1607_v23, %v1591_v26  ;;  %v903_v42 = vadd.f32 %v1607_v23, %v1591_v26  ;;  %v2118_v44 = vmul.f32 %v1609_v35, %v1593_v36  ;;  %v905_v9 = vadd.f32 %v1609_v35, %v1593_v36  ;;  %v1306_v35 = vld [vmem:[%s2201_s29] sm:$0xff] }
  0x9e   : > { %v2075_v29 = vpop.permute.xlu1 %504  ;;  %v2078_v31 = vpop.permute.xlu0 %498  ;;  %v1616_v36 = vsel %vm848_vm7, 1.0, %v1821_v18 }
  0x9f   : > { %vm547_vm6 = vcmp.eq.s32.totalorder %v2078_v31, %v2055_v21  ;;  %951 = vadd.xlane.f32.xlu1 %v887_v28  ;;  %vm549_vm9 = vcmp.eq.s32.totalorder %v2075_v29, %v2055_v21  ;;  %v919_v53 = vsub.f32 %v903_v42, %v887_v28  ;;  %v1313_v29 = vld [vmem:[%s2201_s29 + $0x38] sm:$0xff] }
  0xa0   : > { %v1592_v33 = vsel %vm547_vm6, 1.0, %v1821_v18  ;;  %v1594_v46 = vsel %vm549_vm9, 1.0, %v1821_v18 }
  0xa1   : > { %v2093_v34 = vmul.f32 %v1608_v30, %v1592_v33  ;;  %v906_v50 = vadd.f32 %v1610_v45, %v1594_v46  ;;  %v890_v54 = vmul.f32 %v1610_v45, %v1594_v46  ;;  %v904_v60 = vadd.f32 %v1608_v30, %v1592_v33  ;;  %v1308_v46 = vld [vmem:[%s2201_s29 + $0x10] sm:$0xff] }
  0xa2   : > { %v2101_v38 = vpop.permute.xlu1 %510  ;;  %v2103_v39 = vpop.permute.xlu0 %507  ;;  %v1617_v45 = vsel %vm849_vm8, 1.0, %v1821_v18 }
  0xa3   : > { %vm551_vm10 = vcmp.eq.s32.totalorder %v2101_v38, %v2055_v21  ;;  %953 = vadd.xlane.f32.xlu0 %v2093_v34  ;;  %vm550_vm12 = vcmp.eq.s32.totalorder %v2103_v39, %v2055_v21  ;;  %v922_v62 = vsub.f32 %v906_v50, %v890_v54  ;;  %v920_v16 = vsub.f32 %v904_v60, %v2093_v34  ;;  %v2217_v34 = vld [vmem:[%s2048_s24] ss:$0 sm:$0xff]  ;;  %v1307_v50 = vld [vmem:[%s2201_s29 + $0x8] sm:$0xff]  ;;  %s1425_s24 = sshll.u32 %s356_s17, 4  ;;  %s2769_s24 = int_to_ptr.vmem [resolvable:$true] %s1425_s24 }
  0xa4   : > { %v1596_v40 = vsel %vm551_vm10, 1.0, %v1821_v18  ;;  %v1595_v56 = vsel %vm550_vm12, 1.0, %v1821_v18  ;;  %s1739_s7 = scalar_lea.vmem %s2769_s24, 128 }
  0xa5   : > { %v892_v43 = vmul.f32 %v1612_v37, %v1596_v40  ;;  %v908_v61 = vadd.f32 %v1612_v37, %v1596_v40  ;;  %v2160_v63 = vmul.f32 %v1611_v55, %v1595_v56  ;;  %v907_v17 = vadd.f32 %v1611_v55, %v1595_v56  ;;  %p1740_p12 = scmp.ne.s32.totalorder %s2769_s24, %s1739_s7 }
  0xa6   : > { %v2125_v47 = vpop.permute.xlu1 %516  ;;  %v2127_v48 = vpop.permute.xlu0 %513 }
  0xa7   : > { %961 = vadd.xlane.f32.xlu1 %v892_v43  ;;  %955 = vadd.xlane.f32.xlu0 %v2118_v44  ;;  %vm553_vm14 = vcmp.eq.s32.totalorder %v2125_v47, %v2055_v21  ;;  %vm552_vm1 = vcmp.eq.s32.totalorder %v2127_v48, %v2055_v21  ;;  %v924_v15 = vsub.f32 %v908_v61, %v892_v43  ;;  %p1741_p13 = pnand %p1740_p12, %p1895_p4 }
  0xa8   : > { %v1598_v2 = vsel %vm553_vm14, 1.0, %v1821_v18  ;;  %v1597_v5 = vsel %vm552_vm1, 1.0, %v1821_v18  ;;  %v921_v43 = vsub.f32 %v905_v9, %v2118_v44 }
  0xa9   : > { %v2195_v13 = vmul.f32 %v1614_v1, %v1598_v2  ;;  %v910_v14 = vadd.f32 %v1614_v1, %v1598_v2  ;;  %v2204_v23 = vmul.f32 %v1613_v4, %v1597_v5  ;;  %v2211_v28 = vadd.f32 %v1613_v4, %v1597_v5  ;;  %p1742_p0 = pneg %p1741_p13 }
  0xaa   : > { %v2147_v57 = vpop.permute.xlu0 %519  ;;  %v1822_v2 = vmov 2.0  }
  0xab   : > { %v2152_v59 = vpop.permute.xlu1 %563  ;;  %1031 = vadd.xlane.f32.xlu1 %v919_v53  ;;  %957 = vadd.xlane.f32.xlu0 %v890_v54  ;;  %vm2824_vm4 = vcmp.eq.s32.totalorder %v2147_v57, %v2055_v21  ;;  %v926_v42 = vsub.f32 %v910_v14, %v2195_v13  ;;  %v923_v53 = vsub.f32 %v907_v17, %v2160_v63  ;;  %v2246_v54 = vsel %vm850_vm13, 1.0, %v1821_v18 }
  0xac   : > { %v1599_v10 = vsel %vm2824_vm4, 1.0, %v1821_v18  ;;  %vm1324_vm3 = vcmp.eq.s32.totalorder %v2179_v7, %v2152_v59  ;;  %v925_v60 = vsub.f32 %v2211_v28, %v2204_v23 }
  0xad   : > { %v2213_v30 = vmul.f32 %v1615_v6, %v1599_v10  ;;  %v911_v33 = vadd.f32 %v1615_v6, %v1599_v10  ;;  %v1340_v44 = vsel %vm1324_vm3, %v1306_v35, 0.0  ;;  %v1309_v6 = vld [vmem:[%s2201_s29 + $0x18] sm:$0xff] }
  0xae   : > { %v2170_v3 = vpop.permute.xlu0 %525  ;;  %v1357_v10 = vsel %vm1356_vm15, %v1340_v44, 0.0 }
  0xaf   : > { %1037 = vadd.xlane.f32.xlu1 %v922_v62  ;;  %959 = vadd.xlane.f32.xlu0 %v2160_v63  ;;  %vm2822_vm0 = vcmp.eq.s32.totalorder %v2170_v3, %v2055_v21  ;;  %v927_v56 = vsub.f32 %v911_v33, %v2213_v30 }
  0xb0   : > { %v2190_v11 = vpop.permute.xlu1 %522  ;;  %v1601_v61 = vsel %vm2822_vm0, 1.0, %v1821_v18 }
  0xb1   : > { %vm2821_vm11 = vcmp.eq.s32.totalorder %v2190_v11, %v2055_v21  ;;  %v2282_v35 = vmul.f32 %v1617_v45, %v1601_v61 }
  0xb2   : > { %v2209_v26 = vpop.permute.xlu0 %534  ;;  %v1600_v37 = vsel %vm2821_vm11, 1.0, %v1821_v18  ;;  %vm614_vm11 = vcmp.eq.s32.totalorder %v2152_v59, %v2217_v34  ;;  %v1311_v59 = vld [vmem:[%s2201_s29 + $0x28] sm:$0xff] }
  0xb3   : > { %1041 = vadd.xlane.f32.xlu1 %v924_v15  ;;  %1033 = vadd.xlane.f32.xlu0 %v920_v16  ;;  %v2257_v62 = vmul.f32 %v1616_v36, %v1600_v37  ;;  %v912_v63 = vadd.f32 %v1616_v36, %v1600_v37  ;;  %v630_v16 = vsel %vm614_vm11, 1.0, %v1822_v2  ;;  %v913_v36 = vadd.f32 %v1617_v45, %v1601_v61 }
  0xb5   : > { %v2231_v40 = vpop.permute.xlu1 %569 }
  0xb6   : > { %vm1326_vm7 = vcmp.eq.s32.totalorder %v2179_v7, %v2231_v40 }
  0xb7   : > { %1045 = vadd.xlane.f32.xlu1 %v926_v42  ;;  %1035 = vadd.xlane.f32.xlu0 %v921_v43  ;;  %v567_v55 = vpop.permute.xlu0 %566  ;;  %v1342_v1 = vsel %vm1326_vm7, %v1308_v46, 0.0  ;;  %v1310_v43 = vld [vmem:[%s2201_s29 + $0x20] sm:$0xff] }
  0xb8   : > { %vm615_vm8 = vcmp.eq.s32.totalorder %v567_v55, %v2217_v34  ;;  %vm1325_vm13 = vcmp.eq.s32.totalorder %v2179_v7, %v567_v55  ;;  %v1360_v37 = vsel %vm1356_vm15, %v1342_v1, 0.0  ;;  %v2297_v1 = vld [vmem:[%s2039_s14 + $0x60] sm:$0xff] }
  0xb9   : > { %v631_v4 = vsel %vm615_vm8, 1.0, %v1822_v2  ;;  %v1341_v5 = vsel %vm1325_vm13, %v1307_v50, 0.0  ;;  %v573_v9 = vpop.permute.xlu1 %572  ;;  %vm616_vm13 = vcmp.eq.s32.totalorder %v2231_v40, %v2217_v34  ;;  %v928_v50 = vsub.f32 %v912_v63, %v2257_v62 }
  0xba   : > { %v663_v14 = vsub.f32 %v631_v4, %v2052_v20  ;;  %v1358_v15 = vsel %vm1356_vm15, %v1341_v5, 0.0  ;;  %vm617_vm3 = vcmp.eq.s32.totalorder %v573_v9, %v2217_v34  ;;  %vm1327_vm7 = vcmp.eq.s32.totalorder %v2179_v7, %v573_v9  ;;  %v2355_v9 = vld [vmem:[%s2039_s14 + $0x78] sm:$0xff] }
  0xbb   : > { %v1359_v17 = vadd.f32 %v1358_v15, %v1357_v10  ;;  %v633_v28 = vsel %vm617_vm3, 1.0, %v1822_v2  ;;  %1039 = vadd.xlane.f32.xlu0 %v923_v53  ;;  %1047 = vadd.xlane.f32.xlu1 %v927_v56  ;;  %v2280_v33 = vpop.permute.xlu0 %575  ;;  %v1343_v42 = vsel %vm1327_vm7, %v1309_v6, 0.0  ;;  %v662_v53 = vsub.f32 %v630_v16, %v2043_v19 }
  0xbc   : > { %vm1328_vm0 = vcmp.eq.s32.totalorder %v2179_v7, %v2280_v33  ;;  %v679_v44 = vmax.f32 %v663_v14, 0.0  ;;  %v665_v56 = vsub.f32 %v633_v28, %v2087_v32  ;;  %v1362_v45 = vsel %vm1356_vm15, %v1343_v42, 0.0 }
  0xbd   : > { %v1361_v46 = vadd.f32 %v1360_v37, %v1359_v17  ;;  %v1823_v4 = vmov 1.0   ;;  %v1344_v10 = vsel %vm1328_vm0, %v1310_v43, 0.0  ;;  %v632_v14 = vsel %vm616_vm13, 1.0, %v1822_v2  ;;  %v2318_v17 = vld [vmem:[%s2039_s14 + $0x68] sm:$0xff] }
  0xbe   : > { %v2294_v61 = vpop.permute.xlu1 %528  ;;  %v647_v5 = vsel %vm615_vm8, 10.0, %v1823_v4  ;;  %v1364_v15 = vsel %vm1356_vm15, %v1344_v10, 0.0  ;;  %vm851_vm0 = vcmp.lt.f32.partialorder %v2297_v1, 1.0  ;;  %v681_v37 = vmax.f32 %v665_v56, 0.0 }
  0xbf   : > { %v1363_v6 = vadd.f32 %v1362_v45, %v1361_v46  ;;  %vm2823_vm7 = vcmp.eq.s32.totalorder %v2294_v61, %v2055_v21  ;;  %1043 = vadd.xlane.f32.xlu0 %v925_v60  ;;  %1049 = vadd.xlane.f32.xlu1 %v928_v50  ;;  %v2304_v63 = vpop.permute.xlu0 %584  ;;  %v929_v60 = vsub.f32 %v913_v36, %v2282_v35  ;;  %v678_v50 = vmax.f32 %v662_v53, 0.0 }
  0xc0   : > { %v1602_v55 = vsel %vm2823_vm7, 1.0, %v1821_v18  ;;  %v695_v28 = vmul.f32 %v679_v44, %v647_v5  ;;  %v664_v45 = vsub.f32 %v632_v14, %v2066_v25  ;;  %vm618_vm7 = vcmp.eq.s32.totalorder %v2280_v33, %v2217_v34 }
  0xc1   : > { %v1365_v16 = vadd.f32 %v1364_v15, %v1363_v6  ;;  %v2321_v42 = vmul.f32 %v2246_v54, %v1602_v55  ;;  %v914_v43 = vadd.f32 %v2246_v54, %v1602_v55  ;;  %v646_v54 = vsel %vm614_vm11, 10.0, %v1823_v4 }
  0xc2   : > { %v2324_v46 = vpop.permute.xlu1 %531  ;;  %vm852_vm4 = vcmp.lt.f32.partialorder %v2318_v17, 1.0  ;;  %v649_v53 = vsel %vm617_vm3, 10.0, %v1823_v4  ;;  %v1619_v44 = vsel %vm851_vm0, 1.0, %v1821_v18  ;;  %v711_v10 = vsel %vm547_vm6, %v2052_v20, %v695_v28 }
  0xc3   : > { %vm558_vm8 = vcmp.eq.s32.totalorder %v2324_v46, %v2055_v21  ;;  %1051 = vadd.xlane.f32.xlu1 %v929_v60  ;;  %v2329_v36 = vpop.permute.xlu0 %590  ;;  %v697_v56 = vmul.f32 %v681_v37, %v649_v53  ;;  %v930_v6 = vsub.f32 %v914_v43, %v2321_v42  ;;  %v694_v14 = vmul.f32 %v678_v50, %v646_v54 }
  0xc4   : > { %v1603_v5 = vsel %vm558_vm8, 1.0, %v1821_v18  ;;  %v680_v15 = vmax.f32 %v664_v45, 0.0  ;;  %v634_v55 = vsel %vm618_vm7, 1.0, %v1822_v2  ;;  %vm854_vm11 = vcmp.lt.f32.partialorder %v2355_v9, 1.0  ;;  %v2378_v45 = vld [vmem:[%s2039_s14 + $0x70] sm:$0xff] }
  0xc5   : > { %vm559_vm3 = vcmp.eq.s32.totalorder %v2209_v26, %v2055_v21  ;;  %v648_v20 = vsel %vm616_vm13, 10.0, %v1823_v4  ;;  %1053 = vadd.xlane.f32.xlu0 %v930_v6  ;;  %v2372_v31 = vmul.f32 %v1619_v44, %v1603_v5  ;;  %v915_v28 = vadd.f32 %v1619_v44, %v1603_v5 }
  0xc6   : > { %v666_v54 = vsub.f32 %v634_v55, %v2116_v41  ;;  %v713_v6 = vsel %vm549_vm9, %v2087_v32, %v697_v56  ;;  %v696_v44 = vmul.f32 %v680_v15, %v648_v20  ;;  %vm853_vm13 = vcmp.lt.f32.partialorder %v2378_v45, 1.0 }
  0xc7   : > { %v579_v60 = vpop.permute.xlu1 %578  ;;  %744 = vadd.xlane.f32.xlu1 %v711_v10  ;;  %v2361_v37 = vpop.permute.xlu0 %596  ;;  %v1312_v10 = vld [vmem:[%s2201_s29 + $0x30] sm:$0xff]  ;;  %v1604_v24 = vsel %vm559_vm3, 1.0, %v1821_v18  ;;  %v931_v32 = vsub.f32 %v915_v28, %v2372_v31 }
  0xc8   : > { %vm619_vm6 = vcmp.eq.s32.totalorder %v579_v60, %v2217_v34  ;;  %vm1329_vm0 = vcmp.eq.s32.totalorder %v2179_v7, %v579_v60  ;;  %v682_v56 = vmax.f32 %v666_v54, 0.0  ;;  %v712_v28 = vsel %vm548_vm5, %v2066_v25, %v696_v44 }
  0xc9   : > { %v635_v43 = vsel %vm619_vm6, 1.0, %v1822_v2  ;;  %v1345_v50 = vsel %vm1329_vm0, %v1311_v59, 0.0  ;;  %v710_v59 = vsel %vm546_vm2, %v2043_v19, %v694_v14  ;;  %v1622_v19 = vsel %vm854_vm11, 1.0, %v1821_v18 }
  0xca   : > { %v667_v40 = vsub.f32 %v635_v43, %v2073_v27  ;;  %v1366_v53 = vsel %vm1356_vm15, %v1345_v50, 0.0  ;;  %v1620_v43 = vsel %vm852_vm4, 1.0, %v1821_v18  ;;  %742 = vadd.xlane.f32.xlu0 %v710_v59  ;;  %vm621_vm2 = vcmp.eq.s32.totalorder %v2304_v63, %v2217_v34 }
  0xcb   : > { %v1367_v5 = vadd.f32 %v1366_v53, %v1365_v16  ;;  %v2392_v58 = vpop.permute.xlu1 %581  ;;  %748 = vadd.xlane.f32.xlu1 %v713_v6  ;;  %v2394_v55 = vpop.permute.xlu0 %602  ;;  %vm1331_vm4 = vcmp.eq.s32.totalorder %v2179_v7, %v2304_v63  ;;  %v650_v16 = vsel %vm618_vm7, 10.0, %v1823_v4  ;;  %v651_v20 = vsel %vm619_vm6, 10.0, %v1823_v4  ;;  %v1316_v63 = vld [vmem:[%s2201_s29 + $0x50] sm:$0xff] }
  0xcc   : > { %vm1330_vm9 = vcmp.eq.s32.totalorder %v2179_v7, %v2392_v58  ;;  %v683_v14 = vmax.f32 %v667_v40, 0.0  ;;  %vm620_vm11 = vcmp.eq.s32.totalorder %v2392_v58, %v2217_v34  ;;  %v637_v54 = vsel %vm621_vm2, 1.0, %v1822_v2 }
  0xcd   : > { %v1346_v15 = vsel %vm1330_vm9, %v1312_v10, 0.0  ;;  %v1347_v60 = vsel %vm1331_vm4, %v1313_v29, 0.0  ;;  %v1621_v53 = vsel %vm853_vm13, 1.0, %v1821_v18  ;;  %v2440_v59 = vmul.f32 %v1620_v43, %v1604_v24 }
  0xce   : > { %v1368_v50 = vsel %vm1356_vm15, %v1346_v15, 0.0  ;;  %746 = vadd.xlane.f32.xlu0 %v712_v28  ;;  %v916_v22 = vadd.f32 %v1620_v43, %v1604_v24  ;;  %v698_v25 = vmul.f32 %v682_v56, %v650_v16  ;;  %v699_v44 = vmul.f32 %v683_v14, %v651_v20 }
  0xcf   : > { %1055 = vadd.xlane.f32.xlu1 %v931_v32  ;;  %v2429_v33 = vpop.permute.xlu0 %608  ;;  %v1369_v40 = vadd.f32 %v1368_v50, %v1367_v5  ;;  %v636_v5 = vsel %vm620_vm11, 1.0, %v1822_v2  ;;  %v669_v43 = vsub.f32 %v637_v54, %v2134_v49  ;;  %v1370_v24 = vsel %vm1356_vm15, %v1347_v60, 0.0 }
  0xd0   : > { %v2438_v6 = vpop.permute.xlu1 %537  ;;  %vm629_vm5 = vcmp.eq.s32.totalorder %v2429_v33, %v2217_v34  ;;  %vm623_vm6 = vcmp.eq.s32.totalorder %v2329_v36, %v2217_v34  ;;  %vm1333_vm0 = vcmp.eq.s32.totalorder %v2179_v7, %v2329_v36  ;;  %v668_v15 = vsub.f32 %v636_v5, %v2137_v51 }
  0xd1   : > { %vm560_vm7 = vcmp.eq.s32.totalorder %v2438_v6, %v2055_v21  ;;  %v645_v10 = vsel %vm629_vm5, 1.0, %v1822_v2  ;;  %v1371_v50 = vadd.f32 %v1370_v24, %v1369_v40  ;;  %v661_v28 = vsel %vm629_vm5, 10.0, %v1823_v4  ;;  %v1314_v24 = vld [vmem:[%s2201_s29 + $0x40] sm:$0xff] }
  0xd2   : > { %v677_v29 = vsub.f32 %v645_v10, %v2355_v9  ;;  %v1605_v32 = vsel %vm560_vm7, 1.0, %v1821_v18  ;;  %963 = vadd.xlane.f32.xlu0 %v2204_v23  ;;  %v714_v23 = vsel %vm550_vm12, %v2116_v41, %v698_v25  ;;  %v715_v60 = vsel %vm551_vm10, %v2073_v27, %v699_v44 }
  0xd3   : > { %965 = vadd.xlane.f32.xlu1 %v2195_v13  ;;  %v2466_v16 = vmul.f32 %v1621_v53, %v1605_v32  ;;  %v917_v56 = vadd.f32 %v1621_v53, %v1605_v32  ;;  %v1315_v13 = vld [vmem:[%s2201_s29 + $0x48] sm:$0xff]  ;;  %v932_v39 = vsub.f32 %v916_v22, %v2440_v59  ;;  %v639_v38 = vsel %vm623_vm6, 1.0, %v1822_v2  ;;  %v1317_v22 = vld [vmem:[%s2201_s29 + $0x58] sm:$0xff] }
  0xd4   : > { %v541_v14 = vpop.permute.xlu1 %540  ;;  %v693_v20 = vmax.f32 %v677_v29, 0.0  ;;  %v1349_v27 = vsel %vm1333_vm0, %v1315_v13, 0.0  ;;  %vm1335_vm10 = vcmp.eq.s32.totalorder %v2179_v7, %v2361_v37  ;;  %v684_v44 = vmax.f32 %v668_v15, 0.0 }
  0xd5   : > { %vm561_vm9 = vcmp.eq.s32.totalorder %v541_v14, %v2055_v21  ;;  %v933_v10 = vsub.f32 %v917_v56, %v2466_v16  ;;  %v671_v14 = vsub.f32 %v639_v38, %v2163_v0  ;;  %v1374_v13 = vsel %vm1356_vm15, %v1349_v27, 0.0  ;;  %v1318_v38 = vld [vmem:[%s2201_s29 + $0x60] sm:$0xff] }
  0xd6   : > { %v1606_v54 = vsel %vm561_vm9, 1.0, %v1821_v18  ;;  %v709_v40 = vmul.f32 %v693_v20, %v661_v28  ;;  %v685_v18 = vmax.f32 %v669_v43, 0.0  ;;  %750 = vadd.xlane.f32.xlu0 %v714_v23  ;;  %v653_v43 = vsel %vm621_vm2, 10.0, %v1823_v4 }
  0xd7   : > { %v2487_v53 = vmul.f32 %v1622_v19, %v1606_v54  ;;  %v2489_v5 = vadd.f32 %v1622_v19, %v1606_v54  ;;  %752 = vadd.xlane.f32.xlu1 %v715_v60  ;;  %vm625_vm2 = vcmp.eq.s32.totalorder %v2361_v37, %v2217_v34  ;;  %v1351_v58 = vsel %vm1335_vm10, %v1317_v22, 0.0 }
  0xd8   : > { %v2506_v25 = vsel %vm561_vm9, %v2355_v9, %v709_v40  ;;  %v652_v9 = vsel %vm620_vm11, 10.0, %v1823_v4  ;;  %v701_v56 = vmul.f32 %v685_v18, %v653_v43  ;;  %vm1337_vm5 = vcmp.eq.s32.totalorder %v2179_v7, %v2394_v55 }
  0xd9   : > { %v588_v41 = vpop.permute.xlu1 %587  ;;  %v934_v19 = vsub.f32 %v2489_v5, %v2487_v53  ;;  %v700_v23 = vmul.f32 %v684_v44, %v652_v9  ;;  %v687_v27 = vmax.f32 %v671_v14, 0.0  ;;  %v1378_v22 = vsel %vm1356_vm15, %v1351_v58, 0.0 }
  0xda   : > { %vm622_vm12 = vcmp.eq.s32.totalorder %v588_v41, %v2217_v34  ;;  %vm1332_vm13 = vcmp.eq.s32.totalorder %v2179_v7, %v588_v41  ;;  %1057 = vadd.xlane.f32.xlu0 %v932_v39  ;;  %v641_v41 = vsel %vm625_vm2, 1.0, %v1822_v2  ;;  %v657_v5 = vsel %vm625_vm2, 10.0, %v1823_v4 }
  0xdb   : > { %v638_v29 = vsel %vm622_vm12, 1.0, %v1822_v2  ;;  %v1348_v32 = vsel %vm1332_vm13, %v1314_v24, 0.0  ;;  %1059 = vadd.xlane.f32.xlu1 %v933_v10  ;;  %v654_v40 = vsel %vm622_vm12, 10.0, %v1823_v4  ;;  %vm2830_vm10 = vcmp.eq.s32.totalorder %v2170_v3, %v2055_v21 }
  0xdc   : > { %v670_v15 = vsub.f32 %v638_v29, %v2140_v52  ;;  %v1372_v20 = vsel %vm1356_vm15, %v1348_v32, 0.0  ;;  %vm2831_vm13 = vcmp.eq.s32.totalorder %v2294_v61, %v2055_v21 }
  0xdd   : > { %v1373_v28 = vadd.f32 %v1372_v20, %v1371_v50  ;;  %v594_v54 = vpop.permute.xlu1 %593  ;;  %v1319_v50 = vld [vmem:[%s2201_s29 + $0x68] sm:$0xff]  ;;  %v655_v20 = vsel %vm623_vm6, 10.0, %v1823_v4  ;;  %vm2829_vm6 = vcmp.eq.s32.totalorder %v2190_v11, %v2055_v21 }
  0xde   : > { %v686_v60 = vmax.f32 %v670_v15, 0.0  ;;  %vm624_vm4 = vcmp.eq.s32.totalorder %v594_v54, %v2217_v34  ;;  %vm1334_vm11 = vcmp.eq.s32.totalorder %v2179_v7, %v594_v54  ;;  %967 = vadd.xlane.f32.xlu0 %v2213_v30  ;;  %v717_v30 = vsel %vm553_vm14, %v2134_v49, %v701_v56 }
  0xdf   : > { %v640_v10 = vsel %vm624_vm4, 1.0, %v1822_v2  ;;  %v1350_v18 = vsel %vm1334_vm11, %v1316_v63, 0.0  ;;  %v1375_v24 = vadd.f32 %v1374_v13, %v1373_v28  ;;  %969 = vadd.xlane.f32.xlu1 %v2257_v62  ;;  %v1353_v29 = vsel %vm1337_vm5, %v1319_v50, 0.0 }
  0xe0   : > { %v1376_v39 = vsel %vm1356_vm15, %v1350_v18, 0.0  ;;  %v702_v62 = vmul.f32 %v686_v60, %v654_v40  ;;  %v672_v9 = vsub.f32 %v640_v10, %v2182_v8  ;;  %v716_v15 = vsel %vm552_vm1, %v2137_v51, %v700_v23 }
  0xe1   : > { %v1377_v44 = vadd.f32 %v1376_v39, %v1375_v24  ;;  %v600_v43 = vpop.permute.xlu1 %599  ;;  %v703_v47 = vmul.f32 %v687_v27, %v655_v20  ;;  %v673_v56 = vsub.f32 %v641_v41, %v2193_v12  ;;  %v1382_v13 = vsel %vm1356_vm15, %v1353_v29, 0.0  ;;  %v937_v39 = vld [vmem:[#allocation3 + $0x10] sm:$0xff]  ;;  %v1015_v41 = vld [vmem:[#allocation4] sm:$0xff] }
  0xe2   : > { %vm1336_vm0 = vcmp.eq.s32.totalorder %v2179_v7, %v600_v43  ;;  %vm626_vm9 = vcmp.eq.s32.totalorder %v600_v43, %v2217_v34  ;;  %754 = vadd.xlane.f32.xlu0 %v716_v15  ;;  %v688_v58 = vmax.f32 %v672_v9, 0.0  ;;  %vm2828_vm14 = vcmp.eq.s32.totalorder %v2147_v57, %v2055_v21  ;;  %v938_v21 = vld [vmem:[#allocation3 + $0x18] sm:$0xff]  ;;  %v1016_v15 = vld [vmem:[#allocation4 + $0x8] sm:$0xff] }
  0xe3   : > { %v1352_v32 = vsel %vm1336_vm0, %v1318_v38, 0.0  ;;  %v1379_v14 = vadd.f32 %v1378_v22, %v1377_v44  ;;  %756 = vadd.xlane.f32.xlu1 %v717_v30  ;;  %v718_v48 = vsel %vm2828_vm14, %v2140_v52, %v702_v62  ;;  %v656_v51 = vsel %vm624_vm4, 10.0, %v1823_v4  ;;  %v1018_v43 = vld [vmem:[#allocation4 + $0x18] sm:$0xff]  ;;  %v939_v62 = vld [vmem:[#allocation3 + $0x20] sm:$0xff] }
  0xe4   : > { %v1380_v63 = vsel %vm1356_vm15, %v1352_v32, 0.0  ;;  %v642_v36 = vsel %vm626_vm9, 1.0, %v1822_v2  ;;  %vm627_vm1 = vcmp.eq.s32.totalorder %v2394_v55, %v2217_v34  ;;  %v689_v57 = vmax.f32 %v673_v56, 0.0  ;;  %v1022_v56 = vld [vmem:[#allocation4 + $0x38] sm:$0xff] }
  0xe5   : > { %v1381_v49 = vadd.f32 %v1380_v63, %v1379_v14  ;;  %v704_v52 = vmul.f32 %v688_v58, %v656_v51  ;;  %v674_v23 = vsub.f32 %v642_v36, %v2297_v1  ;;  %v719_v54 = vsel %vm2829_vm6, %v2163_v0, %v703_v47  ;;  %v2604_v18 = vpop.permute.xlu1 %605  ;;  %v1020_v14 = vld [vmem:[#allocation4 + $0x28] sm:$0xff] }
  0xe6   : > { %1061 = vadd.xlane.f32.xlu0 %v934_v19  ;;  %v643_v60 = vsel %vm627_vm1, 1.0, %v1822_v2  ;;  %v705_v19 = vmul.f32 %v689_v57, %v657_v5  ;;  %v658_v11 = vsel %vm626_vm9, 10.0, %v1823_v4  ;;  %vm628_vm12 = vcmp.eq.s32.totalorder %v2604_v18, %v2217_v34  ;;  %v1023_v57 = vld [vmem:[#allocation4 + $0x40] sm:$0xff] }
  0xe7   : > { %758 = vadd.xlane.f32.xlu1 %v718_v48  ;;  %v2582_v28 = vadd.f32 %v1382_v13, %v1381_v49  ;;  %v675_v40 = vsub.f32 %v643_v60, %v2318_v17  ;;  %v690_v10 = vmax.f32 %v674_v23, 0.0  ;;  %v720_v0 = vsel %vm2830_vm10, %v2182_v8, %v704_v52  ;;  %v1017_v13 = vld [vmem:[#allocation4 + $0x10] sm:$0xff]  ;;  %v1019_v52 = vld [vmem:[#allocation4 + $0x20] sm:$0xff] }
  0xe8   : > { %v721_v24 = vsel %vm2831_vm13, %v2193_v12, %v705_v19  ;;  %v644_v3 = vsel %vm628_vm12, 1.0, %v1822_v2  ;;  %v659_v8 = vsel %vm627_vm1, 10.0, %v1823_v4  ;;  %v660_v46 = vsel %vm628_vm12, 10.0, %v1823_v4  ;;  %v940_v4 = vld [vmem:[#allocation3 + $0x28] sm:$0xff] }
  0xe9   : > { %v706_v37 = vmul.f32 %v690_v10, %v658_v11  ;;  %v676_v12 = vsub.f32 %v644_v3, %v2378_v45  ;;  %v1024_v19 = vld [vmem:[#allocation4 + $0x48] sm:$0xff] }
  0xea   : > { %971 = vadd.xlane.f32.xlu0 %v2282_v35  ;;  %v691_v35 = vmax.f32 %v675_v40, 0.0  ;;  %v1021_v40 = vld [vmem:[#allocation4 + $0x30] sm:$0xff] }
  0xeb   : > { %760 = vadd.xlane.f32.xlu1 %v719_v54  ;;  %v722_v61 = vsel %vm558_vm8, %v2297_v1, %v706_v37  ;;  %vm2832_vm8 = vcmask 7168   ;;  %v1025_v37 = vld [vmem:[#allocation4 + $0x50] sm:$0xff] }
  0xee   : > { %973 = vadd.xlane.f32.xlu0 %v2321_v42  ;;  %v707_v42 = vmul.f32 %v691_v35, %v659_v8  ;;  %v727_v8 = vld [vmem:[#allocation2 + $0x8] sm:$0xff] }
  0xef   : > { %762 = vadd.xlane.f32.xlu1 %v720_v0 }
  0xf0   : > { %v723_v2 = vsel %vm559_vm3, %v2318_v17, %v707_v42  ;;  %v935_v17 = vld [vmem:[#allocation3] sm:$0xff]  ;;  %vm2833_vm3 = vmmov %vm2832_vm8  ;;  %v1026_v42 = vld [vmem:[#allocation4 + $0x58] sm:$0xff] }
  0xf1   : > { %vm2835_vm2 = vmmov %vm2833_vm3 }
  0xf2   : > { %975 = vadd.xlane.f32.xlu0 %v2372_v31  ;;  %v692_v31 = vmax.f32 %v676_v12, 0.0  ;;  %vm2836_vm4 = vmmov %vm2835_vm2 }
  0xf3   : > { %764 = vadd.xlane.f32.xlu1 %v721_v24  ;;  %vm2837_vm11 = vmmov %vm2835_vm2 }
  0xf4   : > { %v708_v1 = vmul.f32 %v692_v31, %v660_v46  ;;  %vm2838_vm5 = vmmov %vm2835_vm2  ;;  %v729_v46 = vld [vmem:[#allocation2 + $0x18] sm:$0xff] }
  0xf5   : > { %vm2839_vm0 = vmmov %vm2835_vm2 }
  0xf6   : > { %977 = vadd.xlane.f32.xlu0 %v2440_v59  ;;  %v724_v26 = vsel %vm560_vm7, %v2378_v45, %v708_v1  ;;  %vm2834_vm7 = vmmov %vm2833_vm3  ;;  %v726_v1 = vld [vmem:[#allocation2] sm:$0xff] }
  0xf7   : > { %766 = vadd.xlane.f32.xlu1 %v722_v61  ;;  %vm2840_vm9 = vmmov %vm2839_vm0 }
  0xf8   : > { %vm2841_vm14 = vmmov %vm2839_vm0 }
  0xf9   : > { %vm2842_vm1 = vmmov %vm2839_vm0 }
  0xfa   : > { %979 = vadd.xlane.f32.xlu0 %v2466_v16  ;;  %v936_v16 = vld [vmem:[#allocation3 + $0x8] sm:$0xff]  ;;  %vm2843_vm6 = vmmov %vm2839_vm0 }
  0xfb   : > { %768 = vadd.xlane.f32.xlu1 %v723_v2  ;;  %vm2844_vm10 = vmmov %vm2839_vm0 }
  0xfc   : > { %vm2845_vm12 = vmmov %vm2839_vm0 }
  0xfd   : > { %vm2846_vm13 = vmmov %vm2839_vm0 }
  0xfe   : > { %981 = vadd.xlane.f32.xlu0 %v2487_v53 }
  0xff   : > { %772 = vadd.xlane.f32.xlu1 %v2506_v25 }
 0x102   : > { %770 = vadd.xlane.f32.xlu0 %v724_v26 }
 0x12c   : > { %v952_v55 = vpop.xlane.xlu1 %951 }
 0x12d   : > { %v983_v59 = vadd.f32 %v952_v55, %v935_v17 }
 0x12f   : > { %999 = vst.msk [vmem:[#allocation3] sm:$0xff] %vm2832_vm8, %v983_v59  ;;  %vm2847_vm8 = vmmov %vm2839_vm0 }
 0x130   : > { %v954_v50 = vpop.xlane.xlu0 %953 }
 0x131   : > { %v984_v34 = vadd.f32 %v954_v50, %v936_v16  ;;  %v1027_v50 = vld [vmem:[#allocation4 + $0x60] sm:$0xff] }
 0x133   : > { %1000 = vst.msk [vmem:[#allocation3 + $0x8] sm:$0xff] %vm2833_vm3, %v984_v34  ;;  %vm2848_vm3 = vmmov %vm2839_vm0 }
 0x134   : > { %v962_v25 = vpop.xlane.xlu1 %961  ;;  %v956_v53 = vpop.xlane.xlu0 %955 }
 0x135   : > { %v988_v38 = vadd.f32 %v962_v25, %v940_v4  ;;  %v985_v27 = vadd.f32 %v956_v53, %v937_v39  ;;  %v728_v4 = vld [vmem:[#allocation2 + $0x10] sm:$0xff] }
 0x137   : > { %1004 = vst.msk [vmem:[#allocation3 + $0x28] sm:$0xff] %vm2834_vm7, %v988_v38  ;;  %vm2849_vm7 = vmmov %vm2839_vm0 }
 0x138   : > { %1001 = vst.msk [vmem:[#allocation3 + $0x10] sm:$0xff] %vm2835_vm2, %v985_v27  ;;  %v1032_v45 = vpop.xlane.xlu1 %1031  ;;  %v958_v6 = vpop.xlane.xlu0 %957  ;;  %vm2850_vm2 = vmmov %vm2839_vm0 }
 0x139   : > { %v1063_v22 = vadd.f32 %v1032_v45, %v1015_v41  ;;  %v986_v44 = vadd.f32 %v958_v6, %v938_v21  ;;  %v942_v41 = vld [vmem:[#allocation3 + $0x38] sm:$0xff]  ;;  %v941_v21 = vld [vmem:[#allocation3 + $0x30] sm:$0xff] }
 0x13b   : > { %1079 = vst.msk [vmem:[#allocation4] sm:$0xff] %vm2836_vm4, %v1063_v22  ;;  %vm2851_vm4 = vmmov %vm2839_vm0 }
 0x13c   : > { %1002 = vst.msk [vmem:[#allocation3 + $0x18] sm:$0xff] %vm2837_vm11, %v986_v44  ;;  %v1038_v9 = vpop.xlane.xlu1 %1037  ;;  %v960_v30 = vpop.xlane.xlu0 %959  ;;  %vm2852_vm11 = vmmov %vm2839_vm0 }
 0x13d   : > { %v1066_v29 = vadd.f32 %v1038_v9, %v1018_v43  ;;  %v987_v32 = vadd.f32 %v960_v30, %v939_v62  ;;  %v731_v62 = vld [vmem:[#allocation2 + $0x28] sm:$0xff]  ;;  %v730_v9 = vld [vmem:[#allocation2 + $0x20] sm:$0xff] }
 0x13f   : > { %1082 = vst.msk [vmem:[#allocation4 + $0x18] sm:$0xff] %vm2838_vm5, %v1066_v29  ;;  %vm2853_vm5 = vmmov %vm2839_vm0 }
 0x140   : > { %1003 = vst.msk [vmem:[#allocation3 + $0x20] sm:$0xff] %vm2839_vm0, %v987_v32  ;;  %v1042_v20 = vpop.xlane.xlu1 %1041  ;;  %v1034_v63 = vpop.xlane.xlu0 %1033 }
 0x141   : > { %v1068_v47 = vadd.f32 %v1042_v20, %v1020_v14  ;;  %v1064_v49 = vadd.f32 %v1034_v63, %v1016_v15  ;;  %v1029_v20 = vld [vmem:[#allocation4 + $0x70] sm:$0xff] }
 0x142   : > { %v1170_v34 = vld [vmem:[#allocation4] sm:$0xff] }
 0x143   : > { %1084 = vst.msk [vmem:[#allocation4 + $0x28] sm:$0xff] %vm2840_vm9, %v1068_v47  ;;  %vm2854_vm9 = vmmov %vm2839_vm0  ;;  %v1028_v47 = vld [vmem:[#allocation4 + $0x68] sm:$0xff] }
 0x144   : > { %1080 = vst.msk [vmem:[#allocation4 + $0x8] sm:$0xff] %vm2841_vm14, %v1064_v49  ;;  %v1046_v58 = vpop.xlane.xlu1 %1045  ;;  %v1036_v48 = vpop.xlane.xlu0 %1035  ;;  %vm2855_vm14 = vmmov %vm2839_vm0 }
 0x145   : > { %v1070_v51 = vadd.f32 %v1046_v58, %v1022_v56  ;;  %v1065_v36 = vadd.f32 %v1036_v48, %v1017_v13 }
 0x146   : > { %v1173_v44 = vld [vmem:[#allocation4 + $0x18] sm:$0xff] }
 0x147   : > { %1086 = vst.msk [vmem:[#allocation4 + $0x38] sm:$0xff] %vm2842_vm1, %v1070_v51  ;;  %vm2856_vm1 = vmmov %vm2839_vm0 }
 0x148   : > { %1081 = vst.msk [vmem:[#allocation4 + $0x10] sm:$0xff] %vm2843_vm6, %v1065_v36  ;;  %v1048_v23 = vpop.xlane.xlu1 %1047  ;;  %v1040_v54 = vpop.xlane.xlu0 %1039  ;;  %vm2857_vm6 = vmmov %vm2839_vm0  ;;  %v1155_v36 = vld [vmem:[#allocation3 + $0x8] sm:$0xff] }
 0x149   : > { %v1071_v60 = vadd.f32 %v1048_v23, %v1023_v57  ;;  %v1067_v5 = vadd.f32 %v1040_v54, %v1019_v52  ;;  %v944_v52 = vld [vmem:[#allocation3 + $0x48] sm:$0xff]  ;;  %v1154_v23 = vld [vmem:[#allocation3] sm:$0xff] }
 0x14a   : > { %v1175_v56 = vld [vmem:[#allocation4 + $0x28] sm:$0xff] }
 0x14b   : > { %1087 = vst.msk [vmem:[#allocation4 + $0x40] sm:$0xff] %vm2844_vm10, %v1071_v60  ;;  %v1171_v59 = vld [vmem:[#allocation4 + $0x8] sm:$0xff]  ;;  %vm2858_vm10 = vmmov %vm2839_vm0  ;;  %v943_v60 = vld [vmem:[#allocation3 + $0x40] sm:$0xff] }
 0x14c   : > { %1083 = vst.msk [vmem:[#allocation4 + $0x20] sm:$0xff] %vm2845_vm12, %v1067_v5  ;;  %v1050_v10 = vpop.xlane.xlu1 %1049  ;;  %v1044_v0 = vpop.xlane.xlu0 %1043  ;;  %1707 = vrcp.f32 %v1171_v59  ;;  %v1156_v5 = vld [vmem:[#allocation3 + $0x10] sm:$0xff]  ;;  %vm2859_vm12 = vmmov %vm2839_vm0 }
 0x14d   : > { %v1072_v11 = vadd.f32 %v1050_v10, %v1024_v19  ;;  %v1069_v35 = vadd.f32 %v1044_v0, %v1021_v40  ;;  %1709 = vrcp.f32 %v1170_v34  ;;  %v1219_v40 = vld [vmem:[%s2681_s10 + $0x8] sm:$0xff]  ;;  %v734_v34 = vld [vmem:[#allocation2 + $0x40] sm:$0xff] }
 0x14f   : > { %1088 = vst.msk [vmem:[#allocation4 + $0x48] sm:$0xff] %vm2846_vm13, %v1072_v11  ;;  %v1172_v39 = vld [vmem:[#allocation4 + $0x10] sm:$0xff]  ;;  %vm2860_vm13 = vmmov %vm2839_vm0 }
 0x150   : > { %1085 = vst.msk [vmem:[#allocation4 + $0x30] sm:$0xff] %vm2847_vm8, %v1069_v35  ;;  %v1052_v24 = vpop.xlane.xlu1 %1051  ;;  %1711 = vrcp.f32 %v1172_v39  ;;  %v1218_v35 = vld [vmem:[%s2681_s10] sm:$0xff]  ;;  %vm2861_vm8 = vmmov %vm2839_vm0 }
 0x151   : > { %v1073_v3 = vadd.f32 %v1052_v24, %v1025_v37  ;;  %1713 = vrcp.f32 %v1173_v44 }
 0x152   : > { %v1054_v12 = vpop.xlane.xlu0 %1053 }
 0x153   : > { %1089 = vst.msk [vmem:[#allocation4 + $0x50] sm:$0xff] %vm2848_vm3, %v1073_v3  ;;  %v1074_v31 = vadd.f32 %v1054_v12, %v1026_v42  ;;  %v1174_v30 = vld [vmem:[#allocation4 + $0x20] sm:$0xff]  ;;  %v733_v42 = vld [vmem:[#allocation2 + $0x38] sm:$0xff]  ;;  %vm2862_vm3 = vmmov %vm2839_vm0 }
 0x154   : > { %v745_v61 = vpop.xlane.xlu1 %744  ;;  %1715 = vrcp.f32 %v1174_v30  ;;  %v1220_v3 = vld [vmem:[%s2681_s10 + $0x10] sm:$0xff] }
 0x155   : > { %v775_v2 = vadd.f32 %v745_v61, %v727_v8  ;;  %1090 = vst.msk [vmem:[#allocation4 + $0x58] sm:$0xff] %vm2850_vm2, %v1074_v31  ;;  %1717 = vrcp.f32 %v1175_v56  ;;  %v1177_v31 = vld [vmem:[#allocation4 + $0x38] sm:$0xff]  ;;  %vm2864_vm2 = vmmov %vm2839_vm0 }
 0x156   : > { %v1708_v63 = vpop.eup %1707 }
 0x157   : > { %792 = vst.msk [vmem:[#allocation2 + $0x8] sm:$0xff] %vm2849_vm7, %v775_v2  ;;  %v743_v17 = vpop.xlane.xlu0 %742  ;;  %v1710_v49 = vpop.eup %1709  ;;  %v1189_v54 = vmul.f32 %v1708_v63, %v1155_v36  ;;  %v1176_v0 = vld [vmem:[#allocation4 + $0x30] sm:$0xff]  ;;  %vm2863_vm7 = vmmov %vm2839_vm0 }
 0x158   : > { %v749_v26 = vpop.xlane.xlu1 %748  ;;  %v774_v16 = vadd.f32 %v743_v17, %v726_v1  ;;  %v1187_v19 = vmul.f32 %v1710_v49, %v1154_v23  ;;  %v732_v2 = vld [vmem:[#allocation2 + $0x30] sm:$0xff]  ;;  %1719 = vrcp.f32 %v1176_v0  ;;  %v1223_v23 = vld [vmem:[%s2681_s10 + $0x28] sm:$0xff] }
 0x159   : > { %v777_v55 = vadd.f32 %v749_v26, %v729_v46  ;;  %v1235_v61 = vsub.f32 %v1189_v54, %v1219_v40  ;;  %1721 = vrcp.f32 %v1177_v31  ;;  %v736_v40 = vld [vmem:[#allocation2 + $0x50] sm:$0xff] }
 0x15a   : > { %791 = vst.msk [vmem:[#allocation2] sm:$0xff] %vm2852_vm11, %v774_v16  ;;  %v1712_v58 = vpop.eup %1711  ;;  %v1234_v46 = vsub.f32 %v1187_v19, %v1218_v35  ;;  %v1157_v16 = vld [vmem:[#allocation3 + $0x18] sm:$0xff]  ;;  %vm2866_vm11 = vmmov %vm2839_vm0 }
 0x15b   : > { %794 = vst.msk [vmem:[#allocation2 + $0x18] sm:$0xff] %vm2851_vm4, %v777_v55  ;;  %v747_v53 = vpop.xlane.xlu0 %746  ;;  %v1191_v11 = vmul.f32 %v1712_v58, %v1156_v5  ;;  %v1714_v12 = vpop.eup %1713  ;;  %vm2865_vm4 = vmmov %vm2839_vm0 }
 0x15c   : > { %v1056_v25 = vpop.xlane.xlu1 %1055  ;;  %v776_v27 = vadd.f32 %v747_v53, %v728_v4  ;;  %v1178_v4 = vld [vmem:[#allocation4 + $0x40] sm:$0xff]  ;;  %v1193_v39 = vmul.f32 %v1714_v12, %v1157_v16  ;;  %v1030_v53 = vld [vmem:[#allocation4 + $0x78] sm:$0xff] }
 0x15d   : > { %v1075_v38 = vadd.f32 %v1056_v25, %v1027_v50  ;;  %v1236_v26 = vsub.f32 %v1191_v11, %v1220_v3  ;;  %v1251_v25 = vmul.f32 %v1235_v61, %v1235_v61  ;;  %1723 = vrcp.f32 %v1178_v4  ;;  %v1181_v0 = vld [vmem:[#allocation4 + $0x58] sm:$0xff]  ;;  %v1224_v3 = vld [vmem:[%s2681_s10 + $0x30] sm:$0xff]  ;;  %v1225_v4 = vld [vmem:[%s2681_s10 + $0x38] sm:$0xff] }
 0x15e   : > { %793 = vst.msk [vmem:[#allocation2 + $0x10] sm:$0xff] %vm2839_vm0, %v776_v27  ;;  %v1716_v17 = vpop.eup %1715  ;;  %v1221_v27 = vld [vmem:[%s2681_s10 + $0x18] sm:$0xff] }
 0x15f   : > { %1091 = vst.msk [vmem:[#allocation4 + $0x60] sm:$0xff] %vm2853_vm5, %v1075_v38  ;;  %v964_v6 = vpop.xlane.xlu0 %963  ;;  %v1158_v38 = vld [vmem:[#allocation3 + $0x20] sm:$0xff]  ;;  %vm2867_vm5 = vmmov %vm2839_vm0 }
 0x160   : > { %v966_v45 = vpop.xlane.xlu1 %965  ;;  %v989_v43 = vadd.f32 %v964_v6, %v941_v21  ;;  %v1252_v6 = vmul.f32 %v1236_v26, %v1236_v26 }
 0x161   : > { %v990_v22 = vadd.f32 %v966_v45, %v942_v41  ;;  %v1250_v41 = vmul.f32 %v1234_v46, %v1234_v46  ;;  %v1195_v45 = vmul.f32 %v1716_v17, %v1158_v38  ;;  %v1098_v49 = vld [vmem:[#allocation2] sm:$0xff] }
 0x162   : > { %1005 = vst.msk [vmem:[#allocation3 + $0x30] sm:$0xff] %vm2855_vm14, %v989_v43  ;;  %vm2869_vm14 = vmmov %vm2839_vm0  ;;  %v947_v38 = vld [vmem:[#allocation3 + $0x60] sm:$0xff] }
 0x163   : > { %1006 = vst.msk [vmem:[#allocation3 + $0x38] sm:$0xff] %vm2854_vm9, %v990_v22  ;;  %v751_v32 = vpop.xlane.xlu0 %750  ;;  %v1718_v22 = vpop.eup %1717  ;;  %vm2868_vm9 = vmmov %vm2839_vm0 }
 0x164   : > { %v753_v29 = vpop.xlane.xlu1 %752  ;;  %v778_v15 = vadd.f32 %v751_v32, %v730_v9  ;;  %v1222_v9 = vld [vmem:[%s2681_s10 + $0x20] sm:$0xff]  ;;  %v735_v32 = vld [vmem:[#allocation2 + $0x48] sm:$0xff]  ;;  %v1720_v36 = vpop.eup %1719 }
 0x165   : > { %v779_v14 = vadd.f32 %v753_v29, %v731_v62  ;;  %v1179_v62 = vld [vmem:[#allocation4 + $0x48] sm:$0xff]  ;;  %v945_v29 = vld [vmem:[#allocation3 + $0x50] sm:$0xff] }
 0x166   : > { %795 = vst.msk [vmem:[#allocation2 + $0x20] sm:$0xff] %vm2857_vm6, %v778_v15  ;;  %v1267_v15 = vsel %vm2864_vm2, %v1251_v25, 0.0  ;;  %1725 = vrcp.f32 %v1179_v62  ;;  %v1100_v5 = vld [vmem:[#allocation2 + $0x10] sm:$0xff]  ;;  %vm2871_vm6 = vmmov %vm2839_vm0 }
 0x167   : > { %796 = vst.msk [vmem:[#allocation2 + $0x28] sm:$0xff] %vm2856_vm1, %v779_v14  ;;  %v1058_v48 = vpop.xlane.xlu0 %1057  ;;  %v1237_v14 = vsub.f32 %v1193_v39, %v1221_v27  ;;  %vm2870_vm1 = vmmov %vm2839_vm0 }
 0x168   : > { %v1060_v13 = vpop.xlane.xlu1 %1059  ;;  %v1076_v57 = vadd.f32 %v1058_v48, %v1028_v47  ;;  %v1266_v47 = vsel %vm2866_vm11, %v1250_v41, 0.0  ;;  %v1238_v48 = vsub.f32 %v1195_v45, %v1222_v9  ;;  %v1101_v41 = vld [vmem:[#allocation2 + $0x18] sm:$0xff]  ;;  %vm2878_vm2 = vmmov %vm2839_vm0 }
 0x169   : > { %v1077_v51 = vadd.f32 %v1060_v13, %v1029_v20  ;;  %v1159_v20 = vld [vmem:[#allocation3 + $0x28] sm:$0xff]  ;;  %v1160_v63 = vld [vmem:[#allocation3 + $0x30] sm:$0xff]  ;;  %v1268_v54 = vadd.f32 %v1267_v15, %v1266_v47  ;;  %v1253_v35 = vmul.f32 %v1237_v14, %v1237_v14  ;;  %vm2880_vm11 = vmmov %vm2839_vm0 }
 0x16a   : > { %1092 = vst.msk [vmem:[#allocation4 + $0x68] sm:$0xff] %vm2859_vm12, %v1076_v57  ;;  %v1180_v13 = vld [vmem:[#allocation4 + $0x50] sm:$0xff]  ;;  %v1197_v58 = vmul.f32 %v1718_v22, %v1159_v20  ;;  %v1199_v11 = vmul.f32 %v1720_v36, %v1160_v63  ;;  %vm2873_vm12 = vmmov %vm2839_vm0  ;;  %v738_v20 = vld [vmem:[#allocation2 + $0x60] sm:$0xff] }
 0x16b   : > { %1093 = vst.msk [vmem:[#allocation4 + $0x70] sm:$0xff] %vm2858_vm10, %v1077_v51  ;;  %v968_v37 = vpop.xlane.xlu0 %967  ;;  %v1269_v51 = vsel %vm2839_vm0, %v1252_v6, 0.0  ;;  %1727 = vrcp.f32 %v1180_v13  ;;  %vm2872_vm10 = vmmov %vm2839_vm0  ;;  %v1271_v25 = vsel %vm2873_vm12, %v1253_v35, 0.0  ;;  %v948_v13 = vld [vmem:[#allocation3 + $0x68] sm:$0xff] }
 0x16c   : > { %v970_v10 = vpop.xlane.xlu1 %969  ;;  %v991_v8 = vadd.f32 %v968_v37, %v943_v60  ;;  %v1099_v60 = vld [vmem:[#allocation2 + $0x8] sm:$0xff]  ;;  %v1114_v37 = vsel %vm2868_vm9, %v1098_v49, 0.0  ;;  %v1239_v12 = vsub.f32 %v1197_v58, %v1223_v23  ;;  %v1117_v46 = vsel %vm2872_vm10, %v1100_v5, 0.0  ;;  %v1227_v23 = vld [vmem:[%s2681_s10 + $0x48] sm:$0xff]  ;;  %vm2882_vm9 = vmmov %vm2839_vm0 }
 0x16d   : > { %v992_v24 = vadd.f32 %v970_v10, %v944_v52  ;;  %v1161_v10 = vld [vmem:[#allocation3 + $0x38] sm:$0xff]  ;;  %v1115_v31 = vsel %vm2871_vm6, %v1099_v60, 0.0  ;;  %1729 = vrcp.f32 %v1181_v0  ;;  %v1240_v39 = vsub.f32 %v1199_v11, %v1224_v3  ;;  %vm2885_vm6 = vmmov %vm2839_vm0 }
 0x16e   : > { %1007 = vst.msk [vmem:[#allocation3 + $0x40] sm:$0xff] %vm2861_vm8, %v991_v8  ;;  %v1270_v8 = vadd.f32 %v1269_v51, %v1268_v54  ;;  %vm2875_vm8 = vmmov %vm2839_vm0  ;;  %v1103_v36 = vld [vmem:[#allocation2 + $0x28] sm:$0xff] }
 0x16f   : > { %1008 = vst.msk [vmem:[#allocation3 + $0x48] sm:$0xff] %vm2860_vm13, %v992_v24  ;;  %v755_v55 = vpop.xlane.xlu0 %754  ;;  %v946_v24 = vld [vmem:[#allocation3 + $0x58] sm:$0xff]  ;;  %vm2874_vm13 = vmmov %vm2839_vm0  ;;  %v1256_v47 = vmul.f32 %v1240_v39, %v1240_v39 }
 0x170   : > { %v757_v1 = vpop.xlane.xlu1 %756  ;;  %v780_v50 = vadd.f32 %v755_v55, %v732_v2  ;;  %v1254_v2 = vmul.f32 %v1238_v48, %v1238_v48  ;;  %v1272_v27 = vadd.f32 %v1271_v25, %v1270_v8  ;;  %vm2886_vm10 = vmmov %vm2839_vm0 }
 0x171   : > { %v781_v59 = vadd.f32 %v757_v1, %v733_v42  ;;  %v1722_v42 = vpop.eup %1721  ;;  %v1183_v63 = vld [vmem:[#allocation4 + $0x68] sm:$0xff]  ;;  %v1277_v8 = vsel %vm2839_vm0, %v1256_v47, 0.0  ;;  %vm2887_vm12 = vmmov %vm2839_vm0 }
 0x172   : > { %797 = vst.msk [vmem:[#allocation2 + $0x30] sm:$0xff] %vm2863_vm7, %v780_v50  ;;  %v1201_v55 = vmul.f32 %v1722_v42, %v1161_v10  ;;  %v737_v50 = vld [vmem:[#allocation2 + $0x58] sm:$0xff]  ;;  %vm2877_vm7 = vmmov %vm2839_vm0  ;;  %v1123_v42 = vsel %vm2882_vm9, %v1103_v36, 0.0 }
 0x173   : > { %798 = vst.msk [vmem:[#allocation2 + $0x38] sm:$0xff] %vm2862_vm3, %v781_v59  ;;  %v1062_v44 = vpop.xlane.xlu0 %1061  ;;  %v1116_v59 = vadd.f32 %v1115_v31, %v1114_v37  ;;  %vm2876_vm3 = vmmov %vm2839_vm0  ;;  %v1119_v49 = vsel %vm2877_vm7, %v1101_v41, 0.0  ;;  %v739_v37 = vld [vmem:[#allocation2 + $0x68] sm:$0xff]  ;;  %v1228_v31 = vld [vmem:[%s2681_s10 + $0x50] sm:$0xff] }
 0x174   : > { %v759_v21 = vpop.xlane.xlu1 %758  ;;  %v1078_v30 = vadd.f32 %v1062_v44, %v1030_v53  ;;  %v1724_v53 = vpop.eup %1723  ;;  %v1273_v62 = vsel %vm2876_vm3, %v1254_v2, 0.0  ;;  %vm2890_vm3 = vmmov %vm2839_vm0 }
 0x175   : > { %v782_v43 = vadd.f32 %v759_v21, %v734_v34  ;;  %v1162_v17 = vld [vmem:[#allocation3 + $0x40] sm:$0xff]  ;;  %v1118_v45 = vadd.f32 %v1117_v46, %v1116_v59  ;;  %v1726_v14 = vpop.eup %1725  ;;  %v1274_v51 = vadd.f32 %v1273_v62, %v1272_v27  ;;  %v741_v27 = vld [vmem:[#allocation2 + $0x78] sm:$0xff]  ;;  %vm2891_vm7 = vmmov %vm2839_vm0 }
 0x176   : > { %1094 = vst.msk [vmem:[#allocation4 + $0x78] sm:$0xff] %vm2867_vm5, %v1078_v30  ;;  %v1182_v34 = vld [vmem:[#allocation4 + $0x60] sm:$0xff]  ;;  %v1163_v22 = vld [vmem:[#allocation3 + $0x48] sm:$0xff]  ;;  %v1203_v44 = vmul.f32 %v1724_v53, %v1162_v17  ;;  %vm2881_vm5 = vmmov %vm2839_vm0  ;;  %v1728_v5 = vpop.eup %1727 }
 0x177   : > { %799 = vst.msk [vmem:[#allocation2 + $0x40] sm:$0xff] %vm2865_vm4, %v782_v43  ;;  %v972_v57 = vpop.xlane.xlu0 %971  ;;  %v1102_v21 = vld [vmem:[#allocation2 + $0x20] sm:$0xff]  ;;  %v1255_v43 = vmul.f32 %v1239_v12, %v1239_v12  ;;  %1731 = vrcp.f32 %v1182_v34  ;;  %vm2879_vm4 = vmmov %vm2839_vm0  ;;  %v1205_v48 = vmul.f32 %v1726_v14, %v1163_v22  ;;  %v949_v12 = vld [vmem:[#allocation3 + $0x70] sm:$0xff] }
 0x178   : > { %v761_v56 = vpop.xlane.xlu1 %760  ;;  %v993_v19 = vadd.f32 %v972_v57, %v945_v29  ;;  %v1226_v29 = vld [vmem:[%s2681_s10 + $0x40] sm:$0xff]  ;;  %v1120_v57 = vadd.f32 %v1119_v49, %v1118_v45  ;;  %1733 = vrcp.f32 %v1183_v63  ;;  %v1229_v34 = vld [vmem:[%s2681_s10 + $0x58] sm:$0xff]  ;;  %vm2896_vm9 = vmmov %vm2839_vm0 }
 0x179   : > { %v783_v52 = vadd.f32 %v761_v56, %v735_v32  ;;  %v1241_v32 = vsub.f32 %v1201_v55, %v1225_v4  ;;  %v1121_v56 = vsel %vm2878_vm2, %v1102_v21, 0.0  ;;  %v1242_v54 = vsub.f32 %v1203_v44, %v1226_v29  ;;  %v1104_v0 = vld [vmem:[#allocation2 + $0x30] sm:$0xff]  ;;  %vm2892_vm2 = vmmov %vm2839_vm0 }
 0x17a   : > { %1009 = vst.msk [vmem:[#allocation3 + $0x50] sm:$0xff] %vm2870_vm1, %v993_v19  ;;  %v1275_v60 = vsel %vm2881_vm5, %v1255_v43, 0.0  ;;  %v1122_v11 = vadd.f32 %v1121_v56, %v1120_v57  ;;  %v1243_v46 = vsub.f32 %v1205_v48, %v1227_v23  ;;  %vm2884_vm1 = vmmov %vm2839_vm0  ;;  %v1125_v59 = vsel %vm2885_vm6, %v1104_v0, 0.0  ;;  %v1105_v39 = vld [vmem:[#allocation2 + $0x38] sm:$0xff]  ;;  %v1230_v44 = vld [vmem:[%s2681_s10 + $0x60] sm:$0xff] }
 0x17b   : > { %800 = vst.msk [vmem:[#allocation2 + $0x48] sm:$0xff] %vm2869_vm14, %v783_v52  ;;  %v974_v1 = vpop.xlane.xlu0 %973  ;;  %v1257_v10 = vmul.f32 %v1241_v32, %v1241_v32  ;;  %vm2883_vm14 = vmmov %vm2839_vm0  ;;  %v1258_v55 = vmul.f32 %v1242_v54, %v1242_v54  ;;  %v740_v57 = vld [vmem:[#allocation2 + $0x70] sm:$0xff]  ;;  %v1231_v23 = vld [vmem:[%s2681_s10 + $0x68] sm:$0xff] }
 0x17c   : > { %v763_v61 = vpop.xlane.xlu1 %762  ;;  %v994_v16 = vadd.f32 %v974_v1, %v946_v24  ;;  %v1184_v24 = vld [vmem:[#allocation4 + $0x70] sm:$0xff]  ;;  %v1276_v1 = vadd.f32 %v1275_v60, %v1274_v51  ;;  %v1124_v25 = vadd.f32 %v1123_v42, %v1122_v11  ;;  %v1259_v43 = vmul.f32 %v1243_v46, %v1243_v46  ;;  %vm2895_vm5 = vmmov %vm2839_vm0 }
 0x17d   : > { %v784_v26 = vadd.f32 %v763_v61, %v736_v40  ;;  %v1730_v61 = vpop.eup %1729  ;;  %1735 = vrcp.f32 %v1184_v24  ;;  %v1185_v41 = vld [vmem:[#allocation4 + $0x78] sm:$0xff]  ;;  %v1279_v45 = vsel %vm2886_vm10, %v1257_v10, 0.0  ;;  %vm2899_vm6 = vmmov %vm2839_vm0  ;;  %vm1338_vm10 = vcmp.eq.s32.totalorder %v2179_v7, %v2604_v18 }
 0x17e   : > { %1010 = vst.msk [vmem:[#allocation3 + $0x58] sm:$0xff] %vm2875_vm8, %v994_v16  ;;  %v1278_v4 = vadd.f32 %v1277_v8, %v1276_v1  ;;  %v1106_v62 = vld [vmem:[#allocation2 + $0x40] sm:$0xff]  ;;  %vm2889_vm8 = vmmov %vm2839_vm0  ;;  %1737 = vrcp.f32 %v1185_v41  ;;  %v1233_v41 = vld [vmem:[%s2681_s10 + $0x78] sm:$0xff] }
 0x17f   : > { %801 = vst.msk [vmem:[#allocation2 + $0x50] sm:$0xff] %vm2874_vm13, %v784_v26  ;;  %v976_v9 = vpop.xlane.xlu0 %975  ;;  %vm2888_vm13 = vmmov %vm2839_vm0  ;;  %v1281_v14 = vsel %vm2889_vm8, %v1258_v55, 0.0  ;;  %v1129_v51 = vsel %vm2891_vm7, %v1106_v62, 0.0 }
 0x180   : > { %v765_v6 = vpop.xlane.xlu1 %764  ;;  %v995_v15 = vadd.f32 %v976_v9, %v947_v38  ;;  %v950_v38 = vld [vmem:[#allocation3 + $0x78] sm:$0xff]  ;;  %v1126_v9 = vadd.f32 %v1125_v59, %v1124_v25  ;;  %v1280_v47 = vadd.f32 %v1279_v45, %v1278_v4  ;;  %v1320_v4 = vld [vmem:[%s2201_s29 + $0x70] sm:$0xff]  ;;  %vm2902_vm8 = vmmov %vm2839_vm0 }
 0x181   : > { %v785_v30 = vadd.f32 %v765_v6, %v737_v50  ;;  %v1164_v58 = vld [vmem:[#allocation3 + $0x50] sm:$0xff]  ;;  %v1732_v6 = vpop.eup %1731  ;;  %v1354_v62 = vsel %vm1338_vm10, %v1320_v4, 0.0  ;;  %vm2904_vm7 = vmmov %vm2839_vm0 }
 0x182   : > { %1011 = vst.msk [vmem:[#allocation3 + $0x60] sm:$0xff] %vm2880_vm11, %v995_v15  ;;  %v1207_v3 = vmul.f32 %v1728_v5, %v1164_v58  ;;  %v1127_v15 = vsel %vm2890_vm3, %v1105_v39, 0.0  ;;  %v1107_v49 = vld [vmem:[#allocation2 + $0x48] sm:$0xff]  ;;  %v1734_v36 = vpop.eup %1733  ;;  %v1282_v54 = vadd.f32 %v1281_v14, %v1280_v47  ;;  %vm2894_vm11 = vmmov %vm2839_vm0  ;;  %v1384_v47 = vsel %vm1356_vm15, %v1354_v62, 0.0 }
 0x183   : > { %802 = vst.msk [vmem:[#allocation2 + $0x58] sm:$0xff] %vm2879_vm4, %v785_v30  ;;  %v978_v19 = vpop.xlane.xlu0 %977  ;;  %v1128_v60 = vadd.f32 %v1127_v15, %v1126_v9  ;;  %vm2893_vm4 = vmmov %vm2839_vm0  ;;  %v1131_v10 = vsel %vm2895_vm5, %v1107_v49, 0.0 }
 0x184   : > { %v767_v52 = vpop.xlane.xlu1 %766  ;;  %v996_v35 = vadd.f32 %v978_v19, %v948_v13  ;;  %v1244_v21 = vsub.f32 %v1207_v3, %v1228_v31  ;;  %vm2903_vm3 = vmmov %vm2839_vm0 }
 0x185   : > { %v786_v40 = vadd.f32 %v767_v52, %v738_v20  ;;  %v1165_v2 = vld [vmem:[#allocation3 + $0x58] sm:$0xff]  ;;  %vm2907_vm5 = vmmov %vm2839_vm0 }
 0x186   : > { %1012 = vst.msk [vmem:[#allocation3 + $0x68] sm:$0xff] %vm2884_vm1, %v996_v35  ;;  %v1209_v17 = vmul.f32 %v1730_v61, %v1165_v2  ;;  %v1260_v58 = vmul.f32 %v1244_v21, %v1244_v21  ;;  %v1108_v48 = vld [vmem:[#allocation2 + $0x50] sm:$0xff]  ;;  %v1130_v35 = vadd.f32 %v1129_v51, %v1128_v60  ;;  %v1232_v2 = vld [vmem:[%s2681_s10 + $0x70] sm:$0xff]  ;;  %vm2898_vm1 = vmmov %vm2839_vm0  ;;  %s1743_s10 = sshll.u32 %s1824_s9, 4  ;;  %s1744_s10 = int_to_ptr.vmem [resolvable:$false] %s1743_s10 }
 0x187   : > { %803 = vst.msk [vmem:[#allocation2 + $0x60] sm:$0xff] %vm2883_vm14, %v786_v40  ;;  %v980_v16 = vpop.xlane.xlu0 %979  ;;  %v1283_v40 = vsel %vm2894_vm11, %v1259_v43, 0.0  ;;  %v1736_v61 = vpop.eup %1735  ;;  %vm2897_vm14 = vmmov %vm2839_vm0  ;;  %s1745_s11 = scalar_lea.vmem %s1744_s10, 256  ;;  %p1746_p1 = scmp.lt.s32.totalorder %s2769_s24, %s1744_s10 }
 0x188   : > { %v769_v26 = vpop.xlane.xlu1 %768  ;;  %v997_v53 = vadd.f32 %v980_v16, %v949_v12  ;;  %v1245_v32 = vsub.f32 %v1209_v17, %v1229_v34  ;;  %v1285_v42 = vsel %vm2896_vm9, %v1260_v58, 0.0  ;;  %v1284_v31 = vadd.f32 %v1283_v40, %v1282_v54  ;;  %vm2906_vm11 = vmmov %vm2839_vm0  ;;  %p1747_p2 = scmp.lt.s32.totalorder %s1745_s11, %s1739_s7 }
 0x189   : > { %v787_v50 = vadd.f32 %v769_v26, %v739_v37  ;;  %v1166_v22 = vld [vmem:[#allocation3 + $0x60] sm:$0xff]  ;;  %v1133_v37 = vsel %vm2839_vm0, %v1108_v48, 0.0  ;;  %v1132_v1 = vadd.f32 %v1131_v10, %v1130_v35 }
 0x18a   : > { %1013 = vst.msk [vmem:[#allocation3 + $0x70] sm:$0xff] %vm2888_vm13, %v997_v53  ;;  %v1211_v29 = vmul.f32 %v1732_v6, %v1166_v22  ;;  %v1261_v19 = vmul.f32 %v1245_v32, %v1245_v32  ;;  %v1109_v11 = vld [vmem:[#allocation2 + $0x58] sm:$0xff]  ;;  %v1286_v16 = vadd.f32 %v1285_v42, %v1284_v31  ;;  %vm2901_vm13 = vmmov %vm2839_vm0  ;;  %p1748_p3 = por %p1747_p2, %p1746_p1 }
 0x18b   : > { %804 = vst.msk [vmem:[#allocation2 + $0x68] sm:$0xff] %vm2887_vm12, %v787_v50  ;;  %v982_v20 = vpop.xlane.xlu0 %981  ;;  %v1135_v59 = vsel %vm2899_vm6, %v1109_v11, 0.0  ;;  %v1134_v34 = vadd.f32 %v1133_v37, %v1132_v1  ;;  %vm2900_vm12 = vmmov %vm2839_vm0 }
 0x18c   : > { %v773_v30 = vpop.xlane.xlu1 %772  ;;  %v998_v56 = vadd.f32 %v982_v20, %v950_v38  ;;  %v1246_v13 = vsub.f32 %v1211_v29, %v1230_v44  ;;  %v1287_v55 = vsel %vm2898_vm1, %v1261_v19, 0.0  ;;  %v1738_v38 = vpop.eup %1737  ;;  %p1749_p5 = pnand %p1748_p3, %p1742_p0 }
 0x18d   : > { %v789_v63 = vadd.f32 %v773_v30, %v741_v27  ;;  %v1167_v52 = vld [vmem:[#allocation3 + $0x68] sm:$0xff]  ;;  %v1288_v21 = vadd.f32 %v1287_v55, %v1286_v16  ;;  %v1136_v45 = vadd.f32 %v1135_v59, %v1134_v34 }
 0x18e   : > { %1014 = vst.msk [vmem:[#allocation3 + $0x78] sm:$0xff] %vm2893_vm4, %v998_v56  ;;  %v1213_v5 = vmul.f32 %v1734_v36, %v1167_v52  ;;  %v1262_v8 = vmul.f32 %v1246_v13, %v1246_v13  ;;  %v1110_v46 = vld [vmem:[#allocation2 + $0x60] sm:$0xff]  ;;  %vm2905_vm4 = vmmov %vm2839_vm0 }
 0x18f   : > { %806 = vst.msk [vmem:[#allocation2 + $0x78] sm:$0xff] %vm2892_vm2, %v789_v63  ;;  %v771_v0 = vpop.xlane.xlu0 %770  ;;  %v1137_v53 = vsel %vm2901_vm13, %v1110_v46, 0.0  ;;  %v1321_v63 = vld [vmem:[%s2201_s29 + $0x78] sm:$0xff]  ;;  %vm1339_vm2 = vcmp.eq.s32.totalorder %v2179_v7, %v2429_v33  ;;  %s2767_s29 = scalar_lea.hbm %s2819_s5, %s1624_s16 }
 0x190   : > { %v788_v24 = vadd.f32 %v771_v0, %v740_v57  ;;  %v1247_v3 = vsub.f32 %v1213_v5, %v1231_v23  ;;  %v1289_v25 = vsel %vm2900_vm12, %v1262_v8, 0.0  ;;  %v1138_v18 = vadd.f32 %v1137_v53, %v1136_v45 }
 0x191   : > { %v1168_v12 = vld [vmem:[#allocation3 + $0x70] sm:$0xff]  ;;  %v1290_v9 = vadd.f32 %v1289_v25, %v1288_v21  ;;  %v1355_v36 = vsel %vm1339_vm2, %v1321_v63, 0.0  ;;  %v1385_v23 = vadd.f32 %v1384_v47, %v2582_v28 }
 0x192   : > { %805 = vst.msk [vmem:[#allocation2 + $0x70] sm:$0xff] %vm2897_vm14, %v788_v24  ;;  %v1215_v26 = vmul.f32 %v1736_v61, %v1168_v12  ;;  %v1263_v17 = vmul.f32 %v1247_v3, %v1247_v3  ;;  %v1111_v50 = vld [vmem:[#allocation2 + $0x68] sm:$0xff]  ;;  %v1386_v7 = vsel %vm1356_vm15, %v1355_v36, 0.0 }
 0x193   : > { %v1139_v43 = vsel %vm2903_vm3, %v1111_v50, 0.0  ;;  %v1387_v33 = vadd.f32 %v1386_v7, %v1385_v23 }
 0x194   : > { %v1248_v39 = vsub.f32 %v1215_v26, %v1232_v2  ;;  %v1291_v44 = vsel %vm2902_vm8, %v1263_v17, 0.0  ;;  %v1140_v20 = vadd.f32 %v1139_v43, %v1138_v18  ;;  %v2908_v26 = vlaneseq }
 0x195   : > { %v1169_v27 = vld [vmem:[#allocation3 + $0x78] sm:$0xff]  ;;  %v1292_v32 = vadd.f32 %v1291_v44, %v1290_v9 }
 0x196   : > { %v1217_v6 = vmul.f32 %v1738_v38, %v1169_v27  ;;  %v1264_v22 = vmul.f32 %v1248_v39, %v1248_v39  ;;  %v1113_v15 = vld [vmem:[#allocation2 + $0x78] sm:$0xff]  ;;  %v1399_v17 = vshrl.u32 %v2908_v26, 7 }
 0x197   : > { %v1143_v51 = vsel %vm2907_vm5, %v1113_v15, 0.0 }
 0x198   : > { %v1249_v30 = vsub.f32 %v1217_v6, %v1233_v41  ;;  %v1293_v29 = vsel %vm2904_vm7, %v1264_v22, 0.0  ;;  %vm1402_vm15 = vcmp.eq.s32.totalorder %v1399_v17, 2  ;;  %vm1401_vm0 = vcmp.eq.s32.totalorder %v1399_v17, 1 }
 0x199   : > { %v1112_v14 = vld [vmem:[#allocation2 + $0x70] sm:$0xff]  ;;  %v1294_v13 = vadd.f32 %v1293_v29, %v1292_v32  ;;  %vm1400_vm9 = vcmp.eq.s32.totalorder %v1399_v17, 0 }
 0x19a   : > { %v1265_v49 = vmul.f32 %v1249_v30, %v1249_v30  ;;  %v1141_v56 = vsel %vm2905_vm4, %v1112_v14, 0.0 }
 0x19b   : > { %v1142_v58 = vadd.f32 %v1141_v56, %v1140_v20 }
 0x19c   : > { %v1295_v48 = vsel %vm2906_vm11, %v1265_v49, 0.0 }
 0x19d   : > { %v1296_v57 = vadd.f32 %v1295_v48, %v1294_v13  ;;  %v1144_v52 = vadd.f32 %v1143_v51, %v1142_v58 }
 0x19f   : > { %1297 = vadd.xlane.f32.xlu1 %v1296_v57  ;;  %1145 = vadd.xlane.f32.xlu0 %v1144_v52 }
 0x1a3   : > { %1388 = vadd.xlane.f32.xlu0 %v1387_v33 }
 0x22c   : > { %v1298_v54 = vpop.xlane.xlu1 %1297  ;;  %v1146_v60 = vpop.xlane.xlu0 %1145 }
 0x22d   : > { %v1299_v5 = vrot.slane %v1298_v54, 4  ;;  %v1147_v19 = vrot.slane %v1146_v60, 4 }
 0x22f   : > { %v1300_v40 = vadd.f32 %v1299_v5, %v1298_v54  ;;  %v1148_v10 = vadd.f32 %v1147_v19, %v1146_v60 }
 0x230   : > { %v1389_v0 = vpop.xlane.xlu0 %1388 }
 0x231   : > { %v1301_v11 = vrot.slane %v1300_v40, 2  ;;  %v1149_v35 = vrot.slane %v1148_v10, 2  ;;  %v1390_v37 = vrot.slane %v1389_v0, 4 }
 0x233   : > { %v1302_v24 = vadd.f32 %v1301_v11, %v1300_v40  ;;  %v1391_v3 = vadd.f32 %v1390_v37, %v1389_v0  ;;  %v1150_v28 = vadd.f32 %v1149_v35, %v1148_v10 }
 0x235   : > { %v1392_v8 = vrot.slane %v1391_v3, 2  ;;  %v1151_v42 = vrot.slane %v1150_v28, 1  ;;  %v1303_v61 = vrot.slane %v1302_v24, 1 }
 0x237   : > { %v1393_v12 = vadd.f32 %v1392_v8, %v1391_v3  ;;  %v1152_v2 = vadd.f32 %v1151_v42, %v1150_v28  ;;  %v1304_v31 = vadd.f32 %v1303_v61, %v1302_v24 }
 0x239   : > { %1631 = vpush %v1152_v2  ;;  %v1394_v46 = vrot.slane %v1393_v12, 1 }
 0x23a   : > { %1633 = vpush %v1304_v31 }
 0x23b   : > { %v1395_v1 = vadd.f32 %v1394_v46, %v1393_v12 }
 0x23d   : > { %1635 = vpush %v1395_v1 }
 0x26a   : > { %s1632_s12 = spop %1631 }
 0x26b   : > { %s1634_s13 = spop %1633  ;;  %v1407_v50 = vstv %s1632_s12 }
 0x26c   : > { %v1405_v59 = vstv %s1634_s13 }
 0x26e   : > { %s1636_s14 = spop %1635 }
 0x26f   : > { %s1397_s15 = ssub.f32 0.0, %s1636_s14 }
 0x271   : > { %v1403_v55 = vstv %s1397_s15 }
 0x272   : > { %v1404_v16 = vsel %vm1402_vm15, %v1403_v55, 0.0 }
 0x273   : > { %v1406_v34 = vsel %vm1401_vm0, %v1405_v59, %v1404_v16 }
 0x274   : > { %v1408_v4 = vsel %vm1400_vm9, %v1407_v50, %v1406_v34 }
 0x275   : > { %1409 = vst [vmem:[%s356_s17] sm:$0xff] %v1408_v4 }
 0x276   : > { %1752 = shalt.err (!%p1749_p5)
}
 0x277   : > { %s1753_s8 = scalar_lea.hbm %s2767_s29, 128  ;;  %s1757_s14 = scalar_lea.hbm %s2819_s5, 256 }
 0x278   : > { %p1754_p6 = scmp.ne.s32.totalorder %s2767_s29, %s1753_s8  ;;  %p1758_p10 = scmp.lt.u32.totalorder %s2767_s29, %s2819_s5 }
 0x279   : > { %p1759_p11 = scmp.lt.u32.totalorder %s1757_s14, %s1753_s8  ;;  %p1761_p13 = scmp.lt.u32.totalorder %s1753_s8, %s2767_s29 }
 0x27a   : > { %p1755_p7 = pnand %p1754_p6, %p1895_p4 }
 0x27b   : > { %p1760_p12 = por %p1759_p11, %p1758_p10 }
 0x27c   : > { %p1756_p9 = pneg %p1755_p7 }
 0x27d   : > { %p1762_p0 = por %p1761_p13, %p1760_p12 }
 0x27f   : > { %p1763_p1 = pnand %p1762_p0, %p1756_p9 }
 0x281   : > { %1766 = shalt.err (!%p1763_p1)
}
 0x282   : > { %1637 = dma.vmem_to_hbm [thread:$0]  (%p1895_p4), %s2769_s24, 128, %s2767_s29, %s1411_s21  }
 0x283 PF: > { %p1643_p2 = scmp.ge.s32.totalorder %s1817_s23, 2  ;;  %s1437_s17 = sand.u32 1, %s1797_s18  }
 0x284   : > { %s1438_s25 = scalar_lea.sflag [#allocation6], %s1437_s17 }
 0x285   : > { %p1640_p3 = pnand %p1643_p2, %p1902_p8 }
 0x287   : > { %1792 = dma.done.wait (!%p1640_p3), %s1438_s25, 128  }
 0x288   : > { %1794 = vsyncadd (!%p1640_p3), %s1438_s25, 4294967168  ;;  %s18_s23 = sadd.s32 1, %s1817_s23   ;;  %s2909_s18 = smov %s1801_s19 }
 0x289   : > { %p15_p5 = scmp.ge.s32.totalorder %s18_s23, 4   ;;  %s2910_s19 = smov %s1805_s20 }
 0x28a   : > { %s2911_s20 = smov %s1908_s6  ;;  %s2912_s21 = smov %s1813_s22 }
 0x28b   : > { %s2913_s22 = smov %s2915_s26  ;;  %17 = sbr.rel (!%p15_p5) target bundleno = 4 (0x4), region = 95 }
 0x292   :  { %1443 = vsyncpa [#allocation6], 1 }
 0x293   :  { %1445 = vsyncpa [#allocation6 + $0x1], 1 }

</bundles_post_ra>
